<compile_context>
chip_gen: v6e
topology: v6e:2x2x1
jax: 0.10.0
libtpu: 0.0.40
codegen_flags: <defaults>
</compile_context>

<pallas_src>
import functools

import jax
import jax.numpy as jnp
from jax import lax
from jax.experimental import pallas as pl
from jax.experimental.pallas import tpu as pltpu


# ----------------------------------------------------------------------------
# Tiled matmul + bias kernel.  Used for (a) the hoisted LSTM input projection
# x @ W_ih + b and (b) the decoder Linear.  x/w are bf16, accumulate in f32.
# ----------------------------------------------------------------------------
def _matmul_bias_kernel(x_ref, w_ref, b_ref, o_ref):
    o_ref[...] = (jnp.dot(x_ref[...], w_ref[...],
                          preferred_element_type=jnp.float32)
                  + b_ref[...]).astype(o_ref.dtype)


def matmul_bias(x, w, b, *, tm=256, tn=512):
    """x: (N, K) bf16, w: (K, M) bf16, b: (1, M) f32 -> (N, M) f32."""
    N, K = x.shape
    M = w.shape[1]
    tm = min(tm, N)
    tn = min(tn, M)
    grid = (pl.cdiv(N, tm), pl.cdiv(M, tn))
    return pl.pallas_call(
        _matmul_bias_kernel,
        out_shape=jax.ShapeDtypeStruct((N, M), jnp.float32),
        grid_spec=pltpu.PrefetchScalarGridSpec(
            num_scalar_prefetch=0,
            grid=grid,
            in_specs=[
                pl.BlockSpec((tm, K), lambda i, j: (i, 0)),
                pl.BlockSpec((K, tn), lambda i, j: (0, j)),
                pl.BlockSpec((1, tn), lambda i, j: (0, j)),
            ],
            out_specs=pl.BlockSpec((tm, tn), lambda i, j: (i, j)),
        ),
        compiler_params=pltpu.CompilerParams(
            dimension_semantics=("parallel", "parallel"),
            vmem_limit_bytes=64 * 1024 * 1024,
        ),
    )(x, w, b)


# ----------------------------------------------------------------------------
# LSTM recurrence kernel.  Grid over time CHUNKS; inside, an unrolled
# fori_loop over Tc timesteps.  Input is the pre-computed projection
# gates_x = x @ W_ih + (b_ih + b_hh); per step we only add h_prev @ W_hh.
# h/c state lives in the constant-index hN/cN output blocks (VMEM-resident
# across the whole grid), so no scratch buffers are needed.
# Gate order follows PyTorch: i, f, g, o along the 4H axis.
# ----------------------------------------------------------------------------
def _lstm_recurrence_kernel(gx_ref, whh_ref, h0_ref, c0_ref,
                            y_ref, hN_ref, cN_ref):
    chunk = pl.program_id(0)

    @pl.when(chunk == 0)
    def _():
        hN_ref[...] = h0_ref[...]
        cN_ref[...] = c0_ref[...]

    Tc = gx_ref.shape[0]
    H = hN_ref.shape[-1]
    whh = whh_ref[...]                              # (H, 4H) bf16, VMEM-resident

    def _sigm(v):
        # sigmoid(x) == 0.5 * tanh(0.5 * x) + 0.5  -> single EUP push per gate.
        return 0.5 * jnp.tanh(0.5 * v) + 0.5

    def step(t, carry):
        h, c = carry                                # f32 (B, H) in vregs
        gates = gx_ref[t] + jnp.dot(h.astype(whh.dtype), whh,
                                    preferred_element_type=jnp.float32)
        # At real sizes H is a multiple of 128 -> lane-aligned gate slices.
        i_g = _sigm(gates[:, 0 * H:1 * H])
        f_g = _sigm(gates[:, 1 * H:2 * H])
        g_g = jnp.tanh(gates[:, 2 * H:3 * H])
        o_g = _sigm(gates[:, 3 * H:4 * H])
        c_new = f_g * c + i_g * g_g
        h_new = o_g * jnp.tanh(c_new)
        y_ref[t] = h_new
        return (h_new, c_new)

    h_fin, c_fin = lax.fori_loop(0, Tc, step,
                                 (hN_ref[...], cN_ref[...]), unroll=True)
    hN_ref[...] = h_fin
    cN_ref[...] = c_fin


def lstm_recurrence(gates_x, w_hh_t, h0, c0, *, time_chunk):
    """gates_x: (T, B, 4H) f32, w_hh_t: (H, 4H) bf16, h0/c0: (B, H) f32."""
    T, B, G = gates_x.shape
    H = h0.shape[-1]
    assert G == 4 * H and T % time_chunk == 0
    n_chunks = T // time_chunk
    return pl.pallas_call(
        _lstm_recurrence_kernel,
        out_shape=(jax.ShapeDtypeStruct((T, B, H), jnp.float32),
                   jax.ShapeDtypeStruct((B, H), jnp.float32),
                   jax.ShapeDtypeStruct((B, H), jnp.float32)),
        grid_spec=pltpu.PrefetchScalarGridSpec(
            num_scalar_prefetch=0,
            grid=(n_chunks,),
            in_specs=[
                pl.BlockSpec((time_chunk, B, 4 * H), lambda c: (c, 0, 0)),
                pl.BlockSpec((H, 4 * H), lambda c: (0, 0)),
                pl.BlockSpec((B, H), lambda c: (0, 0)),
                pl.BlockSpec((B, H), lambda c: (0, 0)),
            ],
            out_specs=[
                pl.BlockSpec((time_chunk, B, H), lambda c: (c, 0, 0)),
                pl.BlockSpec((B, H), lambda c: (0, 0)),
                pl.BlockSpec((B, H), lambda c: (0, 0)),
            ],
        ),
        compiler_params=pltpu.CompilerParams(
            dimension_semantics=("arbitrary",),      # time recurrence is serial
            vmem_limit_bytes=64 * 1024 * 1024,
        ),
    )(gates_x, w_hh_t, h0, c0)


def lstm_layer(x, w_ih_t, w_hh_t, b, h0, c0, *, time_chunk):
    """One LSTM layer over the full sequence.

    x: (T, B, I) f32; w_ih_t: (I, 4H) bf16; w_hh_t: (H, 4H) bf16;
    b: (1, 4H) f32 (b_ih + b_hh); h0/c0: (B, H) f32.
    Returns y (T, B, H) f32, hN (B, H), cN (B, H).
    """
    T, B, I = x.shape
    H = h0.shape[-1]
    # Hoisted input projection: one MXU-filling matmul over all T*B rows.
    gx = matmul_bias(x.reshape(T * B, I).astype(jnp.bfloat16), w_ih_t, b)
    gx = gx.reshape(T, B, 4 * H)
    return lstm_recurrence(gx, w_hh_t, h0, c0, time_chunk=time_chunk)


# ----------------------------------------------------------------------------
# Full model forward (mirrors LSTMModel.forward, eval mode)
# ----------------------------------------------------------------------------
def _pick_time_chunk(T, target=32):
    tc = 1
    for d in range(1, min(T, target) + 1):
        if T % d == 0:
            tc = d
    return tc


def lstm_model_forward(params, tokens, hidden, *, time_chunk=None):
    """tokens: (T, B) int32; hidden = (h0, c0), each (nlayers, B, H)."""
    h0_all, c0_all = hidden
    # Encoder: embedding gather (plain-JAX glue).
    emb = jnp.take(params["emb"], tokens, axis=0)          # (T, B, ninp)
    # emb = dropout(emb) -> identity in eval mode.
    T = emb.shape[0]
    if time_chunk is None:
        time_chunk = _pick_time_chunk(T)

    x = emb
    h_fin, c_fin = [], []
    for l, (w_ih_t, w_hh_t, b) in enumerate(params["lstm"]):
        y, hN, cN = lstm_layer(x, w_ih_t, w_hh_t, b, h0_all[l], c0_all[l],
                               time_chunk=time_chunk)
        h_fin.append(hN)
        c_fin.append(cN)
        x = y                                   # inter-layer dropout = identity (eval)

    # output = dropout(output) -> identity in eval mode.
    T, B, H = x.shape
    dec2d = matmul_bias(x.reshape(T * B, H).astype(jnp.bfloat16),
                        params["w_dec_t"], params["b_dec"])
    decoded = dec2d.reshape(T, B, -1)
    return decoded, (jnp.stack(h_fin, axis=0), jnp.stack(c_fin, axis=0))


# ----------------------------------------------------------------------------
# Pure-JAX reference (same bf16 weights / bf16 matmul inputs, f32 accumulate)
# ----------------------------------------------------------------------------
def lstm_model_reference(params, tokens, hidden):
    h0_all, c0_all = hidden
    x = jnp.take(params["emb"], tokens, axis=0)
    h_fin, c_fin = [], []
    for l, (w_ih_t, w_hh_t, b) in enumerate(params["lstm"]):
        H = w_hh_t.shape[0]

        def step(carry, xt, w_ih_t=w_ih_t, w_hh_t=w_hh_t, b=b, H=H):
            h, c = carry
            gates = (jnp.dot(xt.astype(jnp.bfloat16), w_ih_t,
                             preferred_element_type=jnp.float32)
                     + jnp.dot(h.astype(jnp.bfloat16), w_hh_t,
                               preferred_element_type=jnp.float32)
                     + b[0])
            i = jax.nn.sigmoid(gates[:, 0 * H:1 * H])
            f = jax.nn.sigmoid(gates[:, 1 * H:2 * H])
            g = jnp.tanh(gates[:, 2 * H:3 * H])
            o = jax.nn.sigmoid(gates[:, 3 * H:4 * H])
            c = f * c + i * g
            h = o * jnp.tanh(c)
            return (h, c), h

        (hN, cN), y = lax.scan(step, (h0_all[l], c0_all[l]), x)
        h_fin.append(hN)
        c_fin.append(cN)
        x = y

    T, B, H = x.shape
    dec = (jnp.dot(x.reshape(T * B, H).astype(jnp.bfloat16), params["w_dec_t"],
                   preferred_element_type=jnp.float32)
           + params["b_dec"][0]).reshape(T, B, -1)
    return dec, (jnp.stack(h_fin, 0), jnp.stack(c_fin, 0))


# ----------------------------------------------------------------------------
# Deterministic parameter init (shapes/init style of the PyTorch module).
# Matmul weights are stored pre-transposed and cast to bf16.
# ----------------------------------------------------------------------------
def init_params(key, ntoken, ninp, nhid, nlayers):
    initrange = 0.1
    stdv = 1.0 / float(nhid) ** 0.5
    keys = jax.random.split(key, 2 + 4 * nlayers)

    emb = jax.random.uniform(keys[0], (ntoken, ninp), jnp.float32,
                             -initrange, initrange)
    w_dec = jax.random.uniform(keys[1], (ntoken, nhid), jnp.float32,
                               -initrange, initrange)
    b_dec = jnp.zeros((1, ntoken), jnp.float32)

    lstm = []
    for l in range(nlayers):
        in_dim = ninp if l == 0 else nhid
        k = keys[2 + 4 * l:2 + 4 * (l + 1)]
        w_ih = jax.random.uniform(k[0], (4 * nhid, in_dim), jnp.float32, -stdv, stdv)
        w_hh = jax.random.uniform(k[1], (4 * nhid, nhid), jnp.float32, -stdv, stdv)
        b_ih = jax.random.uniform(k[2], (4 * nhid,), jnp.float32, -stdv, stdv)
        b_hh = jax.random.uniform(k[3], (4 * nhid,), jnp.float32, -stdv, stdv)
        lstm.append((w_ih.T.astype(jnp.bfloat16),
                     w_hh.T.astype(jnp.bfloat16),
                     (b_ih + b_hh)[None, :]))

    return {"emb": emb,
            "w_dec_t": w_dec.T.astype(jnp.bfloat16),
            "b_dec": b_dec,
            "lstm": lstm}


if __name__ == "__main__":
    # Small, lane/sublane-friendly shapes (H multiple of 128, B >= 8).
    ntoken, ninp, nhid, nlayers = 128, 128, 128, 2
    seq_len, batch = 16, 8

    key = jax.random.PRNGKey(0)
    k_par, k_tok, k_h, k_c = jax.random.split(key, 4)

    params = init_params(k_par, ntoken, ninp, nhid, nlayers)
    tokens = jax.random.randint(k_tok, (seq_len, batch), 0, ntoken, jnp.int32)
    h0 = jax.random.normal(k_h, (nlayers, batch, nhid), jnp.float32) * 0.1
    c0 = jax.random.normal(k_c, (nlayers, batch, nhid), jnp.float32) * 0.1

    fwd = jax.jit(functools.partial(lstm_model_forward, time_chunk=8))
    decoded, (hN, cN) = fwd(params, tokens, (h0, c0))
    jax.block_until_ready((decoded, hN, cN))

    dec_ref, (h_ref, c_ref) = lstm_model_reference(params, tokens, (h0, c0))
    assert decoded.shape == (seq_len, batch, ntoken)
    assert hN.shape == (nlayers, batch, nhid) and cN.shape == (nlayers, batch, nhid)
    assert jnp.allclose(decoded, dec_ref, rtol=1e-3, atol=1e-3)
    assert jnp.allclose(hN, h_ref, rtol=1e-3, atol=1e-3)
    assert jnp.allclose(cN, c_ref, rtol=1e-3, atol=1e-3)

    print("KERNEL_OK")
</pallas_src>

<mosaic_0001>
module attributes {stable_mosaic.version = 11 : i64} {
  func.func @_matmul_bias_kernel(%arg0: i32, %arg1: i32, %arg2: memref<128x128xbf16, #tpu.memory_space<vmem>>, %arg3: memref<128x512xbf16, #tpu.memory_space<vmem>>, %arg4: memref<1x512xf32, #tpu.memory_space<vmem>>, %arg5: memref<128x512xf32, #tpu.memory_space<vmem>>) attributes {dimension_semantics = [#tpu.dimension_semantics<parallel>, #tpu.dimension_semantics<parallel>], iteration_bounds = array<i64: 1, 1>, scalar_prefetch = 0 : i64, scratch_operands = 0 : i64, tpu.core_type = #tpu.core_type<tc>, window_params = [{transform_indices = @transform_0, window_bounds = array<i64: 128, 128>}, {transform_indices = @transform_1, window_bounds = array<i64: 128, 512>}, {transform_indices = @transform_2, window_bounds = array<i64: 1, 512>}, {transform_indices = @transform_3, window_bounds = array<i64: 128, 512>}]} {
    %c0 = arith.constant 0 : index
    %c0_0 = arith.constant 0 : index
    %0 = vector.load %arg2[%c0, %c0_0] : memref<128x128xbf16, #tpu.memory_space<vmem>>, vector<128x128xbf16>
    %c0_1 = arith.constant 0 : index
    %c0_2 = arith.constant 0 : index
    %1 = vector.load %arg3[%c0_1, %c0_2] : memref<128x512xbf16, #tpu.memory_space<vmem>>, vector<128x512xbf16>
    %cst = arith.constant dense<0.000000e+00> : vector<128x512xf32>
    %2 = tpu.matmul %0, %1, %cst {dimension_numbers = #tpu.dot_dimension_numbers<[1], [0], [0], [1], [0, 0, 1, 1], [], []>} : vector<128x128xbf16>, vector<128x512xbf16>, vector<128x512xf32> -> vector<128x512xf32>
    %c0_3 = arith.constant 0 : index
    %c0_4 = arith.constant 0 : index
    %3 = vector.load %arg4[%c0_3, %c0_4] : memref<1x512xf32, #tpu.memory_space<vmem>>, vector<1x512xf32>
    %4 = vector.broadcast %3 : vector<1x512xf32> to vector<128x512xf32>
    %5 = arith.addf %2, %4 : vector<128x512xf32>
    %c0_5 = arith.constant 0 : index
    %c0_6 = arith.constant 0 : index
    %6 = vector.load %arg5[%c0_5, %c0_6] : memref<128x512xf32, #tpu.memory_space<vmem>>, vector<128x512xf32>
    tpu.vector_store %arg5[%c0_5, %c0_6], %5 {strides = array<i32>} : memref<128x512xf32, #tpu.memory_space<vmem>>, vector<128x512xf32>,
    return
  }
  func.func @transform_0(%arg0: i32, %arg1: i32) -> (i32, i32) {
    %c0_i32 = arith.constant 0 : i32
    %c0_i32_0 = arith.constant 0 : i32
    return %arg0, %c0_i32 : i32, i32
  }
  func.func @transform_1(%arg0: i32, %arg1: i32) -> (i32, i32) {
    %c0_i32 = arith.constant 0 : i32
    %c0_i32_0 = arith.constant 0 : i32
    return %c0_i32, %arg1 : i32, i32
  }
  func.func @transform_2(%arg0: i32, %arg1: i32) -> (i32, i32) {
    %c0_i32 = arith.constant 0 : i32
    %c0_i32_0 = arith.constant 0 : i32
    return %c0_i32, %arg1 : i32, i32
  }
  func.func @transform_3(%arg0: i32, %arg1: i32) -> (i32, i32) {
    %c0_i32 = arith.constant 0 : i32
    return %arg0, %arg1 : i32, i32
  }
}

module attributes {stable_mosaic.version = 11 : i64} {
  func.func @_lstm_recurrence_kernel(%arg0: i32, %arg1: memref<8x8x512xf32, #tpu.memory_space<vmem>>, %arg2: memref<128x512xbf16, #tpu.memory_space<vmem>>, %arg3: memref<8x128xf32, #tpu.memory_space<vmem>>, %arg4: memref<8x128xf32, #tpu.memory_space<vmem>>, %arg5: memref<8x8x128xf32, #tpu.memory_space<vmem>>, %arg6: memref<8x128xf32, #tpu.memory_space<vmem>>, %arg7: memref<8x128xf32, #tpu.memory_space<vmem>>) attributes {dimension_semantics = [#tpu.dimension_semantics<arbitrary>], iteration_bounds = array<i64: 2>, scalar_prefetch = 0 : i64, scratch_operands = 0 : i64, tpu.core_type = #tpu.core_type<tc>, window_params = [{transform_indices = @transform_0, window_bounds = array<i64: 8, 8, 512>}, {pipeline_mode = #tpu.pipeline_mode<synchronous>, transform_indices = @transform_1, window_bounds = array<i64: 128, 512>}, {pipeline_mode = #tpu.pipeline_mode<synchronous>, transform_indices = @transform_2, window_bounds = array<i64: 8, 128>}, {pipeline_mode = #tpu.pipeline_mode<synchronous>, transform_indices = @transform_3, window_bounds = array<i64: 8, 128>}, {transform_indices = @transform_4, window_bounds = array<i64: 8, 8, 128>}, {pipeline_mode = #tpu.pipeline_mode<synchronous>, transform_indices = @transform_5, window_bounds = array<i64: 8, 128>}, {pipeline_mode = #tpu.pipeline_mode<synchronous>, transform_indices = @transform_6, window_bounds = array<i64: 8, 128>}]} {
    %c0_i32 = arith.constant 0 : i32
    %0 = arith.cmpi eq, %arg0, %c0_i32 : i32
    %1 = arith.extui %0 : i1 to i32
    %c0_i32_0 = arith.constant 0 : i32
    %2 = arith.cmpi ne, %1, %c0_i32_0 : i32
    scf.if %2 {
      %c0_122 = arith.constant 0 : index
      %c0_123 = arith.constant 0 : index
      %336 = vector.load %arg3[%c0_122, %c0_123] : memref<8x128xf32, #tpu.memory_space<vmem>>, vector<8x128xf32>
      %c0_124 = arith.constant 0 : index
      %c0_125 = arith.constant 0 : index
      %337 = vector.load %arg6[%c0_124, %c0_125] : memref<8x128xf32, #tpu.memory_space<vmem>>, vector<8x128xf32>
      tpu.vector_store %arg6[%c0_124, %c0_125], %336 {strides = array<i32>} : memref<8x128xf32, #tpu.memory_space<vmem>>, vector<8x128xf32>,
      %c0_126 = arith.constant 0 : index
      %c0_127 = arith.constant 0 : index
      %338 = vector.load %arg4[%c0_126, %c0_127] : memref<8x128xf32, #tpu.memory_space<vmem>>, vector<8x128xf32>
      %c0_128 = arith.constant 0 : index
      %c0_129 = arith.constant 0 : index
      %339 = vector.load %arg7[%c0_128, %c0_129] : memref<8x128xf32, #tpu.memory_space<vmem>>, vector<8x128xf32>
      tpu.vector_store %arg7[%c0_128, %c0_129], %338 {strides = array<i32>} : memref<8x128xf32, #tpu.memory_space<vmem>>, vector<8x128xf32>,
    } else {
    }
    %c0 = arith.constant 0 : index
    %c0_1 = arith.constant 0 : index
    %3 = vector.load %arg2[%c0, %c0_1] : memref<128x512xbf16, #tpu.memory_space<vmem>>, vector<128x512xbf16>
    %c0_2 = arith.constant 0 : index
    %c0_3 = arith.constant 0 : index
    %4 = vector.load %arg6[%c0_2, %c0_3] : memref<8x128xf32, #tpu.memory_space<vmem>>, vector<8x128xf32>
    %c0_4 = arith.constant 0 : index
    %c0_5 = arith.constant 0 : index
    %5 = vector.load %arg7[%c0_4, %c0_5] : memref<8x128xf32, #tpu.memory_space<vmem>>, vector<8x128xf32>
    %c0_i32_6 = arith.constant 0 : i32
    %6 = arith.index_cast %c0_i32_6 : i32 to index
    %c0_7 = arith.constant 0 : index
    %c0_8 = arith.constant 0 : index
    %7 = vector.load %arg1[%6, %c0_7, %c0_8] : memref<8x8x512xf32, #tpu.memory_space<vmem>>, vector<1x8x512xf32>
    %8 = vector.shape_cast %7 : vector<1x8x512xf32> to vector<8x512xf32>
    %9 = arith.truncf %4 : vector<8x128xf32> to vector<8x128xbf16>
    %cst = arith.constant dense<0.000000e+00> : vector<8x512xf32>
    %10 = tpu.matmul %9, %3, %cst {dimension_numbers = #tpu.dot_dimension_numbers<[1], [0], [0], [1], [0, 0, 1, 1], [], []>} : vector<8x128xbf16>, vector<128x512xbf16>, vector<8x512xf32> -> vector<8x512xf32>
    %11 = arith.addf %8, %10 : vector<8x512xf32>
    %12 = vector.extract_strided_slice %11 {offsets = [0, 0], sizes = [8, 128], strides = [1, 1]} : vector<8x512xf32> to vector<8x128xf32>
    %cst_9 = arith.constant 5.000000e-01 : f32
    %13 = vector.broadcast %cst_9 : f32 to vector<8x128xf32>
    %14 = arith.mulf %13, %12 : vector<8x128xf32>
    %15 = math.tanh %14 : vector<8x128xf32>
    %cst_10 = arith.constant 5.000000e-01 : f32
    %16 = vector.broadcast %cst_10 : f32 to vector<8x128xf32>
    %17 = arith.mulf %16, %15 : vector<8x128xf32>
    %cst_11 = arith.constant 5.000000e-01 : f32
    %18 = vector.broadcast %cst_11 : f32 to vector<8x128xf32>
    %19 = arith.addf %17, %18 : vector<8x128xf32>
    %20 = vector.extract_strided_slice %11 {offsets = [0, 128], sizes = [8, 128], strides = [1, 1]} : vector<8x512xf32> to vector<8x128xf32>
    %cst_12 = arith.constant 5.000000e-01 : f32
    %21 = vector.broadcast %cst_12 : f32 to vector<8x128xf32>
    %22 = arith.mulf %21, %20 : vector<8x128xf32>
    %23 = math.tanh %22 : vector<8x128xf32>
    %cst_13 = arith.constant 5.000000e-01 : f32
    %24 = vector.broadcast %cst_13 : f32 to vector<8x128xf32>
    %25 = arith.mulf %24, %23 : vector<8x128xf32>
    %cst_14 = arith.constant 5.000000e-01 : f32
    %26 = vector.broadcast %cst_14 : f32 to vector<8x128xf32>
    %27 = arith.addf %25, %26 : vector<8x128xf32>
    %28 = vector.extract_strided_slice %11 {offsets = [0, 256], sizes = [8, 128], strides = [1, 1]} : vector<8x512xf32> to vector<8x128xf32>
    %29 = math.tanh %28 : vector<8x128xf32>
    %30 = vector.extract_strided_slice %11 {offsets = [0, 384], sizes = [8, 128], strides = [1, 1]} : vector<8x512xf32> to vector<8x128xf32>
    %cst_15 = arith.constant 5.000000e-01 : f32
    %31 = vector.broadcast %cst_15 : f32 to vector<8x128xf32>
    %32 = arith.mulf %31, %30 : vector<8x128xf32>
    %33 = math.tanh %32 : vector<8x128xf32>
    %cst_16 = arith.constant 5.000000e-01 : f32
    %34 = vector.broadcast %cst_16 : f32 to vector<8x128xf32>
    %35 = arith.mulf %34, %33 : vector<8x128xf32>
    %cst_17 = arith.constant 5.000000e-01 : f32
    %36 = vector.broadcast %cst_17 : f32 to vector<8x128xf32>
    %37 = arith.addf %35, %36 : vector<8x128xf32>
    %38 = arith.mulf %27, %5 : vector<8x128xf32>
    %39 = arith.mulf %19, %29 : vector<8x128xf32>
    %40 = arith.addf %38, %39 : vector<8x128xf32>
    %41 = math.tanh %40 : vector<8x128xf32>
    %42 = arith.mulf %37, %41 : vector<8x128xf32>
    %43 = arith.index_cast %c0_i32_6 : i32 to index
    %c0_18 = arith.constant 0 : index
    %c0_19 = arith.constant 0 : index
    %44 = vector.load %arg5[%43, %c0_18, %c0_19] : memref<8x8x128xf32, #tpu.memory_space<vmem>>, vector<1x8x128xf32>
    %45 = vector.shape_cast %44 : vector<1x8x128xf32> to vector<8x128xf32>
    %46 = vector.shape_cast %42 : vector<8x128xf32> to vector<1x8x128xf32>
    tpu.vector_store %arg5[%43, %c0_18, %c0_19], %46 {strides = array<i32>} : memref<8x8x128xf32, #tpu.memory_space<vmem>>, vector<1x8x128xf32>,
    %c1_i32 = arith.constant 1 : i32
    %47 = arith.index_cast %c1_i32 : i32 to index
    %c0_20 = arith.constant 0 : index
    %c0_21 = arith.constant 0 : index
    %48 = vector.load %arg1[%47, %c0_20, %c0_21] : memref<8x8x512xf32, #tpu.memory_space<vmem>>, vector<1x8x512xf32>
    %49 = vector.shape_cast %48 : vector<1x8x512xf32> to vector<8x512xf32>
    %50 = arith.truncf %42 : vector<8x128xf32> to vector<8x128xbf16>
    %cst_22 = arith.constant dense<0.000000e+00> : vector<8x512xf32>
    %51 = tpu.matmul %50, %3, %cst_22 {dimension_numbers = #tpu.dot_dimension_numbers<[1], [0], [0], [1], [0, 0, 1, 1], [], []>} : vector<8x128xbf16>, vector<128x512xbf16>, vector<8x512xf32> -> vector<8x512xf32>
    %52 = arith.addf %49, %51 : vector<8x512xf32>
    %53 = vector.extract_strided_slice %52 {offsets = [0, 0], sizes = [8, 128], strides = [1, 1]} : vector<8x512xf32> to vector<8x128xf32>
    %cst_23 = arith.constant 5.000000e-01 : f32
    %54 = vector.broadcast %cst_23 : f32 to vector<8x128xf32>
    %55 = arith.mulf %54, %53 : vector<8x128xf32>
    %56 = math.tanh %55 : vector<8x128xf32>
    %cst_24 = arith.constant 5.000000e-01 : f32
    %57 = vector.broadcast %cst_24 : f32 to vector<8x128xf32>
    %58 = arith.mulf %57, %56 : vector<8x128xf32>
    %cst_25 = arith.constant 5.000000e-01 : f32
    %59 = vector.broadcast %cst_25 : f32 to vector<8x128xf32>
    %60 = arith.addf %58, %59 : vector<8x128xf32>
    %61 = vector.extract_strided_slice %52 {offsets = [0, 128], sizes = [8, 128], strides = [1, 1]} : vector<8x512xf32> to vector<8x128xf32>
    %cst_26 = arith.constant 5.000000e-01 : f32
    %62 = vector.broadcast %cst_26 : f32 to vector<8x128xf32>
    %63 = arith.mulf %62, %61 : vector<8x128xf32>
    %64 = math.tanh %63 : vector<8x128xf32>
    %cst_27 = arith.constant 5.000000e-01 : f32
    %65 = vector.broadcast %cst_27 : f32 to vector<8x128xf32>
    %66 = arith.mulf %65, %64 : vector<8x128xf32>
    %cst_28 = arith.constant 5.000000e-01 : f32
    %67 = vector.broadcast %cst_28 : f32 to vector<8x128xf32>
    %68 = arith.addf %66, %67 : vector<8x128xf32>
    %69 = vector.extract_strided_slice %52 {offsets = [0, 256], sizes = [8, 128], strides = [1, 1]} : vector<8x512xf32> to vector<8x128xf32>
    %70 = math.tanh %69 : vector<8x128xf32>
    %71 = vector.extract_strided_slice %52 {offsets = [0, 384], sizes = [8, 128], strides = [1, 1]} : vector<8x512xf32> to vector<8x128xf32>
    %cst_29 = arith.constant 5.000000e-01 : f32
    %72 = vector.broadcast %cst_29 : f32 to vector<8x128xf32>
    %73 = arith.mulf %72, %71 : vector<8x128xf32>
    %74 = math.tanh %73 : vector<8x128xf32>
    %cst_30 = arith.constant 5.000000e-01 : f32
    %75 = vector.broadcast %cst_30 : f32 to vector<8x128xf32>
    %76 = arith.mulf %75, %74 : vector<8x128xf32>
    %cst_31 = arith.constant 5.000000e-01 : f32
    %77 = vector.broadcast %cst_31 : f32 to vector<8x128xf32>
    %78 = arith.addf %76, %77 : vector<8x128xf32>
    %79 = arith.mulf %68, %40 : vector<8x128xf32>
    %80 = arith.mulf %60, %70 : vector<8x128xf32>
    %81 = arith.addf %79, %80 : vector<8x128xf32>
    %82 = math.tanh %81 : vector<8x128xf32>
    %83 = arith.mulf %78, %82 : vector<8x128xf32>
    %84 = arith.index_cast %c1_i32 : i32 to index
    %c0_32 = arith.constant 0 : index
    %c0_33 = arith.constant 0 : index
    %85 = vector.load %arg5[%84, %c0_32, %c0_33] : memref<8x8x128xf32, #tpu.memory_space<vmem>>, vector<1x8x128xf32>
    %86 = vector.shape_cast %85 : vector<1x8x128xf32> to vector<8x128xf32>
    %87 = vector.shape_cast %83 : vector<8x128xf32> to vector<1x8x128xf32>
    tpu.vector_store %arg5[%84, %c0_32, %c0_33], %87 {strides = array<i32>} : memref<8x8x128xf32, #tpu.memory_space<vmem>>, vector<1x8x128xf32>,
    %c2_i32 = arith.constant 2 : i32
    %88 = arith.index_cast %c2_i32 : i32 to index
    %c0_34 = arith.constant 0 : index
    %c0_35 = arith.constant 0 : index
    %89 = vector.load %arg1[%88, %c0_34, %c0_35] : memref<8x8x512xf32, #tpu.memory_space<vmem>>, vector<1x8x512xf32>
    %90 = vector.shape_cast %89 : vector<1x8x512xf32> to vector<8x512xf32>
    %91 = arith.truncf %83 : vector<8x128xf32> to vector<8x128xbf16>
    %cst_36 = arith.constant dense<0.000000e+00> : vector<8x512xf32>
    %92 = tpu.matmul %91, %3, %cst_36 {dimension_numbers = #tpu.dot_dimension_numbers<[1], [0], [0], [1], [0, 0, 1, 1], [], []>} : vector<8x128xbf16>, vector<128x512xbf16>, vector<8x512xf32> -> vector<8x512xf32>
    %93 = arith.addf %90, %92 : vector<8x512xf32>
    %94 = vector.extract_strided_slice %93 {offsets = [0, 0], sizes = [8, 128], strides = [1, 1]} : vector<8x512xf32> to vector<8x128xf32>
    %cst_37 = arith.constant 5.000000e-01 : f32
    %95 = vector.broadcast %cst_37 : f32 to vector<8x128xf32>
    %96 = arith.mulf %95, %94 : vector<8x128xf32>
    %97 = math.tanh %96 : vector<8x128xf32>
    %cst_38 = arith.constant 5.000000e-01 : f32
    %98 = vector.broadcast %cst_38 : f32 to vector<8x128xf32>
    %99 = arith.mulf %98, %97 : vector<8x128xf32>
    %cst_39 = arith.constant 5.000000e-01 : f32
    %100 = vector.broadcast %cst_39 : f32 to vector<8x128xf32>
    %101 = arith.addf %99, %100 : vector<8x128xf32>
    %102 = vector.extract_strided_slice %93 {offsets = [0, 128], sizes = [8, 128], strides = [1, 1]} : vector<8x512xf32> to vector<8x128xf32>
    %cst_40 = arith.constant 5.000000e-01 : f32
    %103 = vector.broadcast %cst_40 : f32 to vector<8x128xf32>
    %104 = arith.mulf %103, %102 : vector<8x128xf32>
    %105 = math.tanh %104 : vector<8x128xf32>
    %cst_41 = arith.constant 5.000000e-01 : f32
    %106 = vector.broadcast %cst_41 : f32 to vector<8x128xf32>
    %107 = arith.mulf %106, %105 : vector<8x128xf32>
    %cst_42 = arith.constant 5.000000e-01 : f32
    %108 = vector.broadcast %cst_42 : f32 to vector<8x128xf32>
    %109 = arith.addf %107, %108 : vector<8x128xf32>
    %110 = vector.extract_strided_slice %93 {offsets = [0, 256], sizes = [8, 128], strides = [1, 1]} : vector<8x512xf32> to vector<8x128xf32>
    %111 = math.tanh %110 : vector<8x128xf32>
    %112 = vector.extract_strided_slice %93 {offsets = [0, 384], sizes = [8, 128], strides = [1, 1]} : vector<8x512xf32> to vector<8x128xf32>
    %cst_43 = arith.constant 5.000000e-01 : f32
    %113 = vector.broadcast %cst_43 : f32 to vector<8x128xf32>
    %114 = arith.mulf %113, %112 : vector<8x128xf32>
    %115 = math.tanh %114 : vector<8x128xf32>
    %cst_44 = arith.constant 5.000000e-01 : f32
    %116 = vector.broadcast %cst_44 : f32 to vector<8x128xf32>
    %117 = arith.mulf %116, %115 : vector<8x128xf32>
    %cst_45 = arith.constant 5.000000e-01 : f32
    %118 = vector.broadcast %cst_45 : f32 to vector<8x128xf32>
    %119 = arith.addf %117, %118 : vector<8x128xf32>
    %120 = arith.mulf %109, %81 : vector<8x128xf32>
    %121 = arith.mulf %101, %111 : vector<8x128xf32>
    %122 = arith.addf %120, %121 : vector<8x128xf32>
    %123 = math.tanh %122 : vector<8x128xf32>
    %124 = arith.mulf %119, %123 : vector<8x128xf32>
    %125 = arith.index_cast %c2_i32 : i32 to index
    %c0_46 = arith.constant 0 : index
    %c0_47 = arith.constant 0 : index
    %126 = vector.load %arg5[%125, %c0_46, %c0_47] : memref<8x8x128xf32, #tpu.memory_space<vmem>>, vector<1x8x128xf32>
    %127 = vector.shape_cast %126 : vector<1x8x128xf32> to vector<8x128xf32>
    %128 = vector.shape_cast %124 : vector<8x128xf32> to vector<1x8x128xf32>
    tpu.vector_store %arg5[%125, %c0_46, %c0_47], %128 {strides = array<i32>} : memref<8x8x128xf32, #tpu.memory_space<vmem>>, vector<1x8x128xf32>,
    %c3_i32 = arith.constant 3 : i32
    %129 = arith.index_cast %c3_i32 : i32 to index
    %c0_48 = arith.constant 0 : index
    %c0_49 = arith.constant 0 : index
    %130 = vector.load %arg1[%129, %c0_48, %c0_49] : memref<8x8x512xf32, #tpu.memory_space<vmem>>, vector<1x8x512xf32>
    %131 = vector.shape_cast %130 : vector<1x8x512xf32> to vector<8x512xf32>
    %132 = arith.truncf %124 : vector<8x128xf32> to vector<8x128xbf16>
    %cst_50 = arith.constant dense<0.000000e+00> : vector<8x512xf32>
    %133 = tpu.matmul %132, %3, %cst_50 {dimension_numbers = #tpu.dot_dimension_numbers<[1], [0], [0], [1], [0, 0, 1, 1], [], []>} : vector<8x128xbf16>, vector<128x512xbf16>, vector<8x512xf32> -> vector<8x512xf32>
    %134 = arith.addf %131, %133 : vector<8x512xf32>
    %135 = vector.extract_strided_slice %134 {offsets = [0, 0], sizes = [8, 128], strides = [1, 1]} : vector<8x512xf32> to vector<8x128xf32>
    %cst_51 = arith.constant 5.000000e-01 : f32
    %136 = vector.broadcast %cst_51 : f32 to vector<8x128xf32>
    %137 = arith.mulf %136, %135 : vector<8x128xf32>
    %138 = math.tanh %137 : vector<8x128xf32>
    %cst_52 = arith.constant 5.000000e-01 : f32
    %139 = vector.broadcast %cst_52 : f32 to vector<8x128xf32>
    %140 = arith.mulf %139, %138 : vector<8x128xf32>
    %cst_53 = arith.constant 5.000000e-01 : f32
    %141 = vector.broadcast %cst_53 : f32 to vector<8x128xf32>
    %142 = arith.addf %140, %141 : vector<8x128xf32>
    %143 = vector.extract_strided_slice %134 {offsets = [0, 128], sizes = [8, 128], strides = [1, 1]} : vector<8x512xf32> to vector<8x128xf32>
    %cst_54 = arith.constant 5.000000e-01 : f32
    %144 = vector.broadcast %cst_54 : f32 to vector<8x128xf32>
    %145 = arith.mulf %144, %143 : vector<8x128xf32>
    %146 = math.tanh %145 : vector<8x128xf32>
    %cst_55 = arith.constant 5.000000e-01 : f32
    %147 = vector.broadcast %cst_55 : f32 to vector<8x128xf32>
    %148 = arith.mulf %147, %146 : vector<8x128xf32>
    %cst_56 = arith.constant 5.000000e-01 : f32
    %149 = vector.broadcast %cst_56 : f32 to vector<8x128xf32>
    %150 = arith.addf %148, %149 : vector<8x128xf32>
    %151 = vector.extract_strided_slice %134 {offsets = [0, 256], sizes = [8, 128], strides = [1, 1]} : vector<8x512xf32> to vector<8x128xf32>
    %152 = math.tanh %151 : vector<8x128xf32>
    %153 = vector.extract_strided_slice %134 {offsets = [0, 384], sizes = [8, 128], strides = [1, 1]} : vector<8x512xf32> to vector<8x128xf32>
    %cst_57 = arith.constant 5.000000e-01 : f32
    %154 = vector.broadcast %cst_57 : f32 to vector<8x128xf32>
    %155 = arith.mulf %154, %153 : vector<8x128xf32>
    %156 = math.tanh %155 : vector<8x128xf32>
    %cst_58 = arith.constant 5.000000e-01 : f32
    %157 = vector.broadcast %cst_58 : f32 to vector<8x128xf32>
    %158 = arith.mulf %157, %156 : vector<8x128xf32>
    %cst_59 = arith.constant 5.000000e-01 : f32
    %159 = vector.broadcast %cst_59 : f32 to vector<8x128xf32>
    %160 = arith.addf %158, %159 : vector<8x128xf32>
    %161 = arith.mulf %150, %122 : vector<8x128xf32>
    %162 = arith.mulf %142, %152 : vector<8x128xf32>
    %163 = arith.addf %161, %162 : vector<8x128xf32>
    %164 = math.tanh %163 : vector<8x128xf32>
    %165 = arith.mulf %160, %164 : vector<8x128xf32>
    %166 = arith.index_cast %c3_i32 : i32 to index
    %c0_60 = arith.constant 0 : index
    %c0_61 = arith.constant 0 : index
    %167 = vector.load %arg5[%166, %c0_60, %c0_61] : memref<8x8x128xf32, #tpu.memory_space<vmem>>, vector<1x8x128xf32>
    %168 = vector.shape_cast %167 : vector<1x8x128xf32> to vector<8x128xf32>
    %169 = vector.shape_cast %165 : vector<8x128xf32> to vector<1x8x128xf32>
    tpu.vector_store %arg5[%166, %c0_60, %c0_61], %169 {strides = array<i32>} : memref<8x8x128xf32, #tpu.memory_space<vmem>>, vector<1x8x128xf32>,
    %c4_i32 = arith.constant 4 : i32
    %170 = arith.index_cast %c4_i32 : i32 to index
    %c0_62 = arith.constant 0 : index
    %c0_63 = arith.constant 0 : index
    %171 = vector.load %arg1[%170, %c0_62, %c0_63] : memref<8x8x512xf32, #tpu.memory_space<vmem>>, vector<1x8x512xf32>
    %172 = vector.shape_cast %171 : vector<1x8x512xf32> to vector<8x512xf32>
    %173 = arith.truncf %165 : vector<8x128xf32> to vector<8x128xbf16>
    %cst_64 = arith.constant dense<0.000000e+00> : vector<8x512xf32>
    %174 = tpu.matmul %173, %3, %cst_64 {dimension_numbers = #tpu.dot_dimension_numbers<[1], [0], [0], [1], [0, 0, 1, 1], [], []>} : vector<8x128xbf16>, vector<128x512xbf16>, vector<8x512xf32> -> vector<8x512xf32>
    %175 = arith.addf %172, %174 : vector<8x512xf32>
    %176 = vector.extract_strided_slice %175 {offsets = [0, 0], sizes = [8, 128], strides = [1, 1]} : vector<8x512xf32> to vector<8x128xf32>
    %cst_65 = arith.constant 5.000000e-01 : f32
    %177 = vector.broadcast %cst_65 : f32 to vector<8x128xf32>
    %178 = arith.mulf %177, %176 : vector<8x128xf32>
    %179 = math.tanh %178 : vector<8x128xf32>
    %cst_66 = arith.constant 5.000000e-01 : f32
    %180 = vector.broadcast %cst_66 : f32 to vector<8x128xf32>
    %181 = arith.mulf %180, %179 : vector<8x128xf32>
    %cst_67 = arith.constant 5.000000e-01 : f32
    %182 = vector.broadcast %cst_67 : f32 to vector<8x128xf32>
    %183 = arith.addf %181, %182 : vector<8x128xf32>
    %184 = vector.extract_strided_slice %175 {offsets = [0, 128], sizes = [8, 128], strides = [1, 1]} : vector<8x512xf32> to vector<8x128xf32>
    %cst_68 = arith.constant 5.000000e-01 : f32
    %185 = vector.broadcast %cst_68 : f32 to vector<8x128xf32>
    %186 = arith.mulf %185, %184 : vector<8x128xf32>
    %187 = math.tanh %186 : vector<8x128xf32>
    %cst_69 = arith.constant 5.000000e-01 : f32
    %188 = vector.broadcast %cst_69 : f32 to vector<8x128xf32>
    %189 = arith.mulf %188, %187 : vector<8x128xf32>
    %cst_70 = arith.constant 5.000000e-01 : f32
    %190 = vector.broadcast %cst_70 : f32 to vector<8x128xf32>
    %191 = arith.addf %189, %190 : vector<8x128xf32>
    %192 = vector.extract_strided_slice %175 {offsets = [0, 256], sizes = [8, 128], strides = [1, 1]} : vector<8x512xf32> to vector<8x128xf32>
    %193 = math.tanh %192 : vector<8x128xf32>
    %194 = vector.extract_strided_slice %175 {offsets = [0, 384], sizes = [8, 128], strides = [1, 1]} : vector<8x512xf32> to vector<8x128xf32>
    %cst_71 = arith.constant 5.000000e-01 : f32
    %195 = vector.broadcast %cst_71 : f32 to vector<8x128xf32>
    %196 = arith.mulf %195, %194 : vector<8x128xf32>
    %197 = math.tanh %196 : vector<8x128xf32>
    %cst_72 = arith.constant 5.000000e-01 : f32
    %198 = vector.broadcast %cst_72 : f32 to vector<8x128xf32>
    %199 = arith.mulf %198, %197 : vector<8x128xf32>
    %cst_73 = arith.constant 5.000000e-01 : f32
    %200 = vector.broadcast %cst_73 : f32 to vector<8x128xf32>
    %201 = arith.addf %199, %200 : vector<8x128xf32>
    %202 = arith.mulf %191, %163 : vector<8x128xf32>
    %203 = arith.mulf %183, %193 : vector<8x128xf32>
    %204 = arith.addf %202, %203 : vector<8x128xf32>
    %205 = math.tanh %204 : vector<8x128xf32>
    %206 = arith.mulf %201, %205 : vector<8x128xf32>
    %207 = arith.index_cast %c4_i32 : i32 to index
    %c0_74 = arith.constant 0 : index
    %c0_75 = arith.constant 0 : index
    %208 = vector.load %arg5[%207, %c0_74, %c0_75] : memref<8x8x128xf32, #tpu.memory_space<vmem>>, vector<1x8x128xf32>
    %209 = vector.shape_cast %208 : vector<1x8x128xf32> to vector<8x128xf32>
    %210 = vector.shape_cast %206 : vector<8x128xf32> to vector<1x8x128xf32>
    tpu.vector_store %arg5[%207, %c0_74, %c0_75], %210 {strides = array<i32>} : memref<8x8x128xf32, #tpu.memory_space<vmem>>, vector<1x8x128xf32>,
    %c5_i32 = arith.constant 5 : i32
    %211 = arith.index_cast %c5_i32 : i32 to index
    %c0_76 = arith.constant 0 : index
    %c0_77 = arith.constant 0 : index
    %212 = vector.load %arg1[%211, %c0_76, %c0_77] : memref<8x8x512xf32, #tpu.memory_space<vmem>>, vector<1x8x512xf32>
    %213 = vector.shape_cast %212 : vector<1x8x512xf32> to vector<8x512xf32>
    %214 = arith.truncf %206 : vector<8x128xf32> to vector<8x128xbf16>
    %cst_78 = arith.constant dense<0.000000e+00> : vector<8x512xf32>
    %215 = tpu.matmul %214, %3, %cst_78 {dimension_numbers = #tpu.dot_dimension_numbers<[1], [0], [0], [1], [0, 0, 1, 1], [], []>} : vector<8x128xbf16>, vector<128x512xbf16>, vector<8x512xf32> -> vector<8x512xf32>
    %216 = arith.addf %213, %215 : vector<8x512xf32>
    %217 = vector.extract_strided_slice %216 {offsets = [0, 0], sizes = [8, 128], strides = [1, 1]} : vector<8x512xf32> to vector<8x128xf32>
    %cst_79 = arith.constant 5.000000e-01 : f32
    %218 = vector.broadcast %cst_79 : f32 to vector<8x128xf32>
    %219 = arith.mulf %218, %217 : vector<8x128xf32>
    %220 = math.tanh %219 : vector<8x128xf32>
    %cst_80 = arith.constant 5.000000e-01 : f32
    %221 = vector.broadcast %cst_80 : f32 to vector<8x128xf32>
    %222 = arith.mulf %221, %220 : vector<8x128xf32>
    %cst_81 = arith.constant 5.000000e-01 : f32
    %223 = vector.broadcast %cst_81 : f32 to vector<8x128xf32>
    %224 = arith.addf %222, %223 : vector<8x128xf32>
    %225 = vector.extract_strided_slice %216 {offsets = [0, 128], sizes = [8, 128], strides = [1, 1]} : vector<8x512xf32> to vector<8x128xf32>
    %cst_82 = arith.constant 5.000000e-01 : f32
    %226 = vector.broadcast %cst_82 : f32 to vector<8x128xf32>
    %227 = arith.mulf %226, %225 : vector<8x128xf32>
    %228 = math.tanh %227 : vector<8x128xf32>
    %cst_83 = arith.constant 5.000000e-01 : f32
    %229 = vector.broadcast %cst_83 : f32 to vector<8x128xf32>
    %230 = arith.mulf %229, %228 : vector<8x128xf32>
    %cst_84 = arith.constant 5.000000e-01 : f32
    %231 = vector.broadcast %cst_84 : f32 to vector<8x128xf32>
    %232 = arith.addf %230, %231 : vector<8x128xf32>
    %233 = vector.extract_strided_slice %216 {offsets = [0, 256], sizes = [8, 128], strides = [1, 1]} : vector<8x512xf32> to vector<8x128xf32>
    %234 = math.tanh %233 : vector<8x128xf32>
    %235 = vector.extract_strided_slice %216 {offsets = [0, 384], sizes = [8, 128], strides = [1, 1]} : vector<8x512xf32> to vector<8x128xf32>
    %cst_85 = arith.constant 5.000000e-01 : f32
    %236 = vector.broadcast %cst_85 : f32 to vector<8x128xf32>
    %237 = arith.mulf %236, %235 : vector<8x128xf32>
    %238 = math.tanh %237 : vector<8x128xf32>
    %cst_86 = arith.constant 5.000000e-01 : f32
    %239 = vector.broadcast %cst_86 : f32 to vector<8x128xf32>
    %240 = arith.mulf %239, %238 : vector<8x128xf32>
    %cst_87 = arith.constant 5.000000e-01 : f32
    %241 = vector.broadcast %cst_87 : f32 to vector<8x128xf32>
    %242 = arith.addf %240, %241 : vector<8x128xf32>
    %243 = arith.mulf %232, %204 : vector<8x128xf32>
    %244 = arith.mulf %224, %234 : vector<8x128xf32>
    %245 = arith.addf %243, %244 : vector<8x128xf32>
    %246 = math.tanh %245 : vector<8x128xf32>
    %247 = arith.mulf %242, %246 : vector<8x128xf32>
    %248 = arith.index_cast %c5_i32 : i32 to index
    %c0_88 = arith.constant 0 : index
    %c0_89 = arith.constant 0 : index
    %249 = vector.load %arg5[%248, %c0_88, %c0_89] : memref<8x8x128xf32, #tpu.memory_space<vmem>>, vector<1x8x128xf32>
    %250 = vector.shape_cast %249 : vector<1x8x128xf32> to vector<8x128xf32>
    %251 = vector.shape_cast %247 : vector<8x128xf32> to vector<1x8x128xf32>
    tpu.vector_store %arg5[%248, %c0_88, %c0_89], %251 {strides = array<i32>} : memref<8x8x128xf32, #tpu.memory_space<vmem>>, vector<1x8x128xf32>,
    %c6_i32 = arith.constant 6 : i32
    %252 = arith.index_cast %c6_i32 : i32 to index
    %c0_90 = arith.constant 0 : index
    %c0_91 = arith.constant 0 : index
    %253 = vector.load %arg1[%252, %c0_90, %c0_91] : memref<8x8x512xf32, #tpu.memory_space<vmem>>, vector<1x8x512xf32>
    %254 = vector.shape_cast %253 : vector<1x8x512xf32> to vector<8x512xf32>
    %255 = arith.truncf %247 : vector<8x128xf32> to vector<8x128xbf16>
    %cst_92 = arith.constant dense<0.000000e+00> : vector<8x512xf32>
    %256 = tpu.matmul %255, %3, %cst_92 {dimension_numbers = #tpu.dot_dimension_numbers<[1], [0], [0], [1], [0, 0, 1, 1], [], []>} : vector<8x128xbf16>, vector<128x512xbf16>, vector<8x512xf32> -> vector<8x512xf32>
    %257 = arith.addf %254, %256 : vector<8x512xf32>
    %258 = vector.extract_strided_slice %257 {offsets = [0, 0], sizes = [8, 128], strides = [1, 1]} : vector<8x512xf32> to vector<8x128xf32>
    %cst_93 = arith.constant 5.000000e-01 : f32
    %259 = vector.broadcast %cst_93 : f32 to vector<8x128xf32>
    %260 = arith.mulf %259, %258 : vector<8x128xf32>
    %261 = math.tanh %260 : vector<8x128xf32>
    %cst_94 = arith.constant 5.000000e-01 : f32
    %262 = vector.broadcast %cst_94 : f32 to vector<8x128xf32>
    %263 = arith.mulf %262, %261 : vector<8x128xf32>
    %cst_95 = arith.constant 5.000000e-01 : f32
    %264 = vector.broadcast %cst_95 : f32 to vector<8x128xf32>
    %265 = arith.addf %263, %264 : vector<8x128xf32>
    %266 = vector.extract_strided_slice %257 {offsets = [0, 128], sizes = [8, 128], strides = [1, 1]} : vector<8x512xf32> to vector<8x128xf32>
    %cst_96 = arith.constant 5.000000e-01 : f32
    %267 = vector.broadcast %cst_96 : f32 to vector<8x128xf32>
    %268 = arith.mulf %267, %266 : vector<8x128xf32>
    %269 = math.tanh %268 : vector<8x128xf32>
    %cst_97 = arith.constant 5.000000e-01 : f32
    %270 = vector.broadcast %cst_97 : f32 to vector<8x128xf32>
    %271 = arith.mulf %270, %269 : vector<8x128xf32>
    %cst_98 = arith.constant 5.000000e-01 : f32
    %272 = vector.broadcast %cst_98 : f32 to vector<8x128xf32>
    %273 = arith.addf %271, %272 : vector<8x128xf32>
    %274 = vector.extract_strided_slice %257 {offsets = [0, 256], sizes = [8, 128], strides = [1, 1]} : vector<8x512xf32> to vector<8x128xf32>
    %275 = math.tanh %274 : vector<8x128xf32>
    %276 = vector.extract_strided_slice %257 {offsets = [0, 384], sizes = [8, 128], strides = [1, 1]} : vector<8x512xf32> to vector<8x128xf32>
    %cst_99 = arith.constant 5.000000e-01 : f32
    %277 = vector.broadcast %cst_99 : f32 to vector<8x128xf32>
    %278 = arith.mulf %277, %276 : vector<8x128xf32>
    %279 = math.tanh %278 : vector<8x128xf32>
    %cst_100 = arith.constant 5.000000e-01 : f32
    %280 = vector.broadcast %cst_100 : f32 to vector<8x128xf32>
    %281 = arith.mulf %280, %279 : vector<8x128xf32>
    %cst_101 = arith.constant 5.000000e-01 : f32
    %282 = vector.broadcast %cst_101 : f32 to vector<8x128xf32>
    %283 = arith.addf %281, %282 : vector<8x128xf32>
    %284 = arith.mulf %273, %245 : vector<8x128xf32>
    %285 = arith.mulf %265, %275 : vector<8x128xf32>
    %286 = arith.addf %284, %285 : vector<8x128xf32>
    %287 = math.tanh %286 : vector<8x128xf32>
    %288 = arith.mulf %283, %287 : vector<8x128xf32>
    %289 = arith.index_cast %c6_i32 : i32 to index
    %c0_102 = arith.constant 0 : index
    %c0_103 = arith.constant 0 : index
    %290 = vector.load %arg5[%289, %c0_102, %c0_103] : memref<8x8x128xf32, #tpu.memory_space<vmem>>, vector<1x8x128xf32>
    %291 = vector.shape_cast %290 : vector<1x8x128xf32> to vector<8x128xf32>
    %292 = vector.shape_cast %288 : vector<8x128xf32> to vector<1x8x128xf32>
    tpu.vector_store %arg5[%289, %c0_102, %c0_103], %292 {strides = array<i32>} : memref<8x8x128xf32, #tpu.memory_space<vmem>>, vector<1x8x128xf32>,
    %c7_i32 = arith.constant 7 : i32
    %293 = arith.index_cast %c7_i32 : i32 to index
    %c0_104 = arith.constant 0 : index
    %c0_105 = arith.constant 0 : index
    %294 = vector.load %arg1[%293, %c0_104, %c0_105] : memref<8x8x512xf32, #tpu.memory_space<vmem>>, vector<1x8x512xf32>
    %295 = vector.shape_cast %294 : vector<1x8x512xf32> to vector<8x512xf32>
    %296 = arith.truncf %288 : vector<8x128xf32> to vector<8x128xbf16>
    %cst_106 = arith.constant dense<0.000000e+00> : vector<8x512xf32>
    %297 = tpu.matmul %296, %3, %cst_106 {dimension_numbers = #tpu.dot_dimension_numbers<[1], [0], [0], [1], [0, 0, 1, 1], [], []>} : vector<8x128xbf16>, vector<128x512xbf16>, vector<8x512xf32> -> vector<8x512xf32>
    %298 = arith.addf %295, %297 : vector<8x512xf32>
    %299 = vector.extract_strided_slice %298 {offsets = [0, 0], sizes = [8, 128], strides = [1, 1]} : vector<8x512xf32> to vector<8x128xf32>
    %cst_107 = arith.constant 5.000000e-01 : f32
    %300 = vector.broadcast %cst_107 : f32 to vector<8x128xf32>
    %301 = arith.mulf %300, %299 : vector<8x128xf32>
    %302 = math.tanh %301 : vector<8x128xf32>
    %cst_108 = arith.constant 5.000000e-01 : f32
    %303 = vector.broadcast %cst_108 : f32 to vector<8x128xf32>
    %304 = arith.mulf %303, %302 : vector<8x128xf32>
    %cst_109 = arith.constant 5.000000e-01 : f32
    %305 = vector.broadcast %cst_109 : f32 to vector<8x128xf32>
    %306 = arith.addf %304, %305 : vector<8x128xf32>
    %307 = vector.extract_strided_slice %298 {offsets = [0, 128], sizes = [8, 128], strides = [1, 1]} : vector<8x512xf32> to vector<8x128xf32>
    %cst_110 = arith.constant 5.000000e-01 : f32
    %308 = vector.broadcast %cst_110 : f32 to vector<8x128xf32>
    %309 = arith.mulf %308, %307 : vector<8x128xf32>
    %310 = math.tanh %309 : vector<8x128xf32>
    %cst_111 = arith.constant 5.000000e-01 : f32
    %311 = vector.broadcast %cst_111 : f32 to vector<8x128xf32>
    %312 = arith.mulf %311, %310 : vector<8x128xf32>
    %cst_112 = arith.constant 5.000000e-01 : f32
    %313 = vector.broadcast %cst_112 : f32 to vector<8x128xf32>
    %314 = arith.addf %312, %313 : vector<8x128xf32>
    %315 = vector.extract_strided_slice %298 {offsets = [0, 256], sizes = [8, 128], strides = [1, 1]} : vector<8x512xf32> to vector<8x128xf32>
    %316 = math.tanh %315 : vector<8x128xf32>
    %317 = vector.extract_strided_slice %298 {offsets = [0, 384], sizes = [8, 128], strides = [1, 1]} : vector<8x512xf32> to vector<8x128xf32>
    %cst_113 = arith.constant 5.000000e-01 : f32
    %318 = vector.broadcast %cst_113 : f32 to vector<8x128xf32>
    %319 = arith.mulf %318, %317 : vector<8x128xf32>
    %320 = math.tanh %319 : vector<8x128xf32>
    %cst_114 = arith.constant 5.000000e-01 : f32
    %321 = vector.broadcast %cst_114 : f32 to vector<8x128xf32>
    %322 = arith.mulf %321, %320 : vector<8x128xf32>
    %cst_115 = arith.constant 5.000000e-01 : f32
    %323 = vector.broadcast %cst_115 : f32 to vector<8x128xf32>
    %324 = arith.addf %322, %323 : vector<8x128xf32>
    %325 = arith.mulf %314, %286 : vector<8x128xf32>
    %326 = arith.mulf %306, %316 : vector<8x128xf32>
    %327 = arith.addf %325, %326 : vector<8x128xf32>
    %328 = math.tanh %327 : vector<8x128xf32>
    %329 = arith.mulf %324, %328 : vector<8x128xf32>
    %330 = arith.index_cast %c7_i32 : i32 to index
    %c0_116 = arith.constant 0 : index
    %c0_117 = arith.constant 0 : index
    %331 = vector.load %arg5[%330, %c0_116, %c0_117] : memref<8x8x128xf32, #tpu.memory_space<vmem>>, vector<1x8x128xf32>
    %332 = vector.shape_cast %331 : vector<1x8x128xf32> to vector<8x128xf32>
    %333 = vector.shape_cast %329 : vector<8x128xf32> to vector<1x8x128xf32>
    tpu.vector_store %arg5[%330, %c0_116, %c0_117], %333 {strides = array<i32>} : memref<8x8x128xf32, #tpu.memory_space<vmem>>, vector<1x8x128xf32>,
    %c8_i32 = arith.constant 8 : i32
    %c0_118 = arith.constant 0 : index
    %c0_119 = arith.constant 0 : index
    %334 = vector.load %arg6[%c0_118, %c0_119] : memref<8x128xf32, #tpu.memory_space<vmem>>, vector<8x128xf32>
    tpu.vector_store %arg6[%c0_118, %c0_119], %329 {strides = array<i32>} : memref<8x128xf32, #tpu.memory_space<vmem>>, vector<8x128xf32>,
    %c0_120 = arith.constant 0 : index
    %c0_121 = arith.constant 0 : index
    %335 = vector.load %arg7[%c0_120, %c0_121] : memref<8x128xf32, #tpu.memory_space<vmem>>, vector<8x128xf32>
    tpu.vector_store %arg7[%c0_120, %c0_121], %327 {strides = array<i32>} : memref<8x128xf32, #tpu.memory_space<vmem>>, vector<8x128xf32>,
    return
  }
  func.func @transform_0(%arg0: i32) -> (i32, i32, i32) {
    %c0_i32 = arith.constant 0 : i32
    %c0_i32_0 = arith.constant 0 : i32
    %c0_i32_1 = arith.constant 0 : i32
    return %arg0, %c0_i32, %c0_i32_0 : i32, i32, i32
  }
  func.func @transform_1(%arg0: i32) -> (i32, i32) {
    %c0_i32 = arith.constant 0 : i32
    %c0_i32_0 = arith.constant 0 : i32
    %c0_i32_1 = arith.constant 0 : i32
    return %c0_i32, %c0_i32_0 : i32, i32
  }
  func.func @transform_2(%arg0: i32) -> (i32, i32) {
    %c0_i32 = arith.constant 0 : i32
    %c0_i32_0 = arith.constant 0 : i32
    %c0_i32_1 = arith.constant 0 : i32
    return %c0_i32, %c0_i32_0 : i32, i32
  }
  func.func @transform_3(%arg0: i32) -> (i32, i32) {
    %c0_i32 = arith.constant 0 : i32
    %c0_i32_0 = arith.constant 0 : i32
    %c0_i32_1 = arith.constant 0 : i32
    return %c0_i32, %c0_i32_0 : i32, i32
  }
  func.func @transform_4(%arg0: i32) -> (i32, i32, i32) {
    %c0_i32 = arith.constant 0 : i32
    %c0_i32_0 = arith.constant 0 : i32
    %c0_i32_1 = arith.constant 0 : i32
    return %arg0, %c0_i32, %c0_i32_0 : i32, i32, i32
  }
  func.func @transform_5(%arg0: i32) -> (i32, i32) {
    %c0_i32 = arith.constant 0 : i32
    %c0_i32_0 = arith.constant 0 : i32
    %c0_i32_1 = arith.constant 0 : i32
    return %c0_i32, %c0_i32_0 : i32, i32
  }
  func.func @transform_6(%arg0: i32) -> (i32, i32) {
    %c0_i32 = arith.constant 0 : i32
    %c0_i32_0 = arith.constant 0 : i32
    %c0_i32_1 = arith.constant 0 : i32
    return %c0_i32, %c0_i32_0 : i32, i32
  }
}

module attributes {stable_mosaic.version = 11 : i64} {
  func.func @_matmul_bias_kernel(%arg0: i32, %arg1: i32, %arg2: memref<128x128xbf16, #tpu.memory_space<vmem>>, %arg3: memref<128x128xbf16, #tpu.memory_space<vmem>>, %arg4: memref<1x128xf32, #tpu.memory_space<vmem>>, %arg5: memref<128x128xf32, #tpu.memory_space<vmem>>) attributes {dimension_semantics = [#tpu.dimension_semantics<parallel>, #tpu.dimension_semantics<parallel>], iteration_bounds = array<i64: 1, 1>, scalar_prefetch = 0 : i64, scratch_operands = 0 : i64, tpu.core_type = #tpu.core_type<tc>, window_params = [{transform_indices = @transform_0, window_bounds = array<i64: 128, 128>}, {transform_indices = @transform_1, window_bounds = array<i64: 128, 128>}, {transform_indices = @transform_2, window_bounds = array<i64: 1, 128>}, {transform_indices = @transform_3, window_bounds = array<i64: 128, 128>}]} {
    %c0 = arith.constant 0 : index
    %c0_0 = arith.constant 0 : index
    %0 = vector.load %arg2[%c0, %c0_0] : memref<128x128xbf16, #tpu.memory_space<vmem>>, vector<128x128xbf16>
    %c0_1 = arith.constant 0 : index
    %c0_2 = arith.constant 0 : index
    %1 = vector.load %arg3[%c0_1, %c0_2] : memref<128x128xbf16, #tpu.memory_space<vmem>>, vector<128x128xbf16>
    %cst = arith.constant dense<0.000000e+00> : vector<128x128xf32>
    %2 = tpu.matmul %0, %1, %cst {dimension_numbers = #tpu.dot_dimension_numbers<[1], [0], [0], [1], [0, 0, 1, 1], [], []>} : vector<128x128xbf16>, vector<128x128xbf16>, vector<128x128xf32> -> vector<128x128xf32>
    %c0_3 = arith.constant 0 : index
    %c0_4 = arith.constant 0 : index
    %3 = vector.load %arg4[%c0_3, %c0_4] : memref<1x128xf32, #tpu.memory_space<vmem>>, vector<1x128xf32>
    %4 = vector.broadcast %3 : vector<1x128xf32> to vector<128x128xf32>
    %5 = arith.addf %2, %4 : vector<128x128xf32>
    %c0_5 = arith.constant 0 : index
    %c0_6 = arith.constant 0 : index
    %6 = vector.load %arg5[%c0_5, %c0_6] : memref<128x128xf32, #tpu.memory_space<vmem>>, vector<128x128xf32>
    tpu.vector_store %arg5[%c0_5, %c0_6], %5 {strides = array<i32>} : memref<128x128xf32, #tpu.memory_space<vmem>>, vector<128x128xf32>,
    return
  }
  func.func @transform_0(%arg0: i32, %arg1: i32) -> (i32, i32) {
    %c0_i32 = arith.constant 0 : i32
    %c0_i32_0 = arith.constant 0 : i32
    return %arg0, %c0_i32 : i32, i32
  }
  func.func @transform_1(%arg0: i32, %arg1: i32) -> (i32, i32) {
    %c0_i32 = arith.constant 0 : i32
    %c0_i32_0 = arith.constant 0 : i32
    return %c0_i32, %arg1 : i32, i32
  }
  func.func @transform_2(%arg0: i32, %arg1: i32) -> (i32, i32) {
    %c0_i32 = arith.constant 0 : i32
    %c0_i32_0 = arith.constant 0 : i32
    return %c0_i32, %arg1 : i32, i32
  }
  func.func @transform_3(%arg0: i32, %arg1: i32) -> (i32, i32) {
    %c0_i32 = arith.constant 0 : i32
    return %arg0, %arg1 : i32, i32
  }
}

</mosaic_0001>

<bundles_post_ra>
// kernel: lstm_model_forward.9
= control target key start
LH: loop header
LB: loop body
LE: loop exit
PB: predicated region body
PF: predicated region fallthrough
CT: control target
= control target key end

     0   :  { %s479_s0 = inlined_call_operand.vmem [shape: bf16[128,128], index: 0, kind: input, shape index: {}]   ;;  %s480_s1 = inlined_call_operand.vmem [shape: bf16[128,128], index: 1, kind: input, shape index: {}]   ;;  %s481_s2 = inlined_call_operand.vmem [shape: f32[1,128], index: 2, kind: input, shape index: {}]   ;;  %s482_s3 = inlined_call_operand.hbm [shape: f32[128,128], index: 3, kind: output, shape index: {}]  }
   0x1   :  { %v364_v0 = vld [vmem:[%s480_s1 + $0x38] sm:$0xff]   ;;  %v365_v1 = vld [vmem:[%s480_s1 + $0x30] sm:$0xff]   ;;  %v366_v2 = vld [vmem:[%s480_s1 + $0x28] sm:$0xff]  }
   0x2   :  { %313 = vmatprep.subr.bf16.mxu0 %v364_v0  ;;  %345 = vmatprep.subr.bf16.mxu1 %v364_v0  ;;  %v367_v3 = vld [vmem:[%s480_s1 + $0x20] sm:$0xff]   ;;  %v368_v6 = vld [vmem:[%s480_s1 + $0x18] sm:$0xff]   ;;  %v369_v7 = vld [vmem:[%s480_s1 + $0x10] sm:$0xff]  }
   0x3   :  { %314 = vmatpush3.bf16.msra.mxu0 %v364_v0  ;;  %353 = vmatpush3.bf16.msra.mxu1 %v364_v0  ;;  %v372_v4 = vld [vmem:[%s479_s0] sm:$0xff]  }
   0x4   :  { %315 = vmatprep.subr.bf16.mxu0 %v365_v1  ;;  %346 = vmatprep.subr.bf16.mxu1 %v365_v1  ;;  %v373_v5 = vld [vmem:[%s479_s0 + $0x20] sm:$0xff]  }
   0x5   :  { %329 = vmatprep.mubr.bf16.mxu0 %v372_v4  ;;  %337 = vmatprep.mubr.bf16.mxu1 %v373_v5 }
   0x7   :  { %316 = vmatpush3.bf16.msra.mxu0 %v365_v1  ;;  %354 = vmatpush3.bf16.msra.mxu1 %v365_v1 }
   0x8   :  { %317 = vmatprep.subr.bf16.mxu0 %v366_v2  ;;  %347 = vmatprep.subr.bf16.mxu1 %v366_v2 }
   0xb   :  { %318 = vmatpush3.bf16.msra.mxu0 %v366_v2  ;;  %355 = vmatpush3.bf16.msra.mxu1 %v366_v2 }
   0xc   :  { %319 = vmatprep.subr.bf16.mxu0 %v367_v3  ;;  %348 = vmatprep.subr.bf16.mxu1 %v367_v3 }
   0xf   :  { %320 = vmatpush3.bf16.msra.mxu0 %v367_v3  ;;  %356 = vmatpush3.bf16.msra.mxu1 %v367_v3 }
  0x10   :  { %321 = vmatprep.subr.bf16.mxu0 %v368_v6  ;;  %349 = vmatprep.subr.bf16.mxu1 %v368_v6 }
  0x11   :  { %8 = vsyncpa [#allocation3], 0  ;;  %v370_v8 = vld [vmem:[%s480_s1 + $0x8] sm:$0xff]   ;;  %v371_v9 = vld [vmem:[%s480_s1] sm:$0xff]  }
  0x12   :  { %v374_v10 = vld [vmem:[%s479_s0 + $0x8] sm:$0xff]   ;;  %v376_v12 = vld [vmem:[%s479_s0 + $0x10] sm:$0xff]   ;;  %v378_v14 = vld [vmem:[%s479_s0 + $0x18] sm:$0xff]  }
  0x13   :  { %322 = vmatpush3.bf16.msra.mxu0 %v368_v6  ;;  %357 = vmatpush3.bf16.msra.mxu1 %v368_v6  ;;  %v375_v11 = vld [vmem:[%s479_s0 + $0x28] sm:$0xff]   ;;  %v377_v13 = vld [vmem:[%s479_s0 + $0x30] sm:$0xff]   ;;  %v379_v15 = vld [vmem:[%s479_s0 + $0x38] sm:$0xff]   ;;  %s402_s0 = smov [#allocation2]  }
  0x14   :  { %323 = vmatprep.subr.bf16.mxu0 %v369_v7  ;;  %350 = vmatprep.subr.bf16.mxu1 %v369_v7  ;;  %v280_v16 = vld [vmem:[%s481_s2] ss:$0 sm:$0xff]  ;;  %s269_s2 = sshll.u32 %s402_s0, 4  ;;  %s270_s2 = int_to_ptr.vmem [resolvable:$true] %s269_s2 }
  0x15   :  { %s380_s18 = scalar_lea.vmem %s270_s2, 2048  ;;  %p385_p1 = scmp.lt.s32.totalorder %s270_s2, %s270_s2 }
  0x16   :  { %p381_p0 = scmp.ne.s32.totalorder %s270_s2, %s380_s18  ;;  %p386_p2 = scmp.lt.s32.totalorder %s380_s18, %s380_s18 }
  0x17   :  { %324 = vmatpush3.bf16.msra.mxu0 %v369_v7  ;;  %358 = vmatpush3.bf16.msra.mxu1 %v369_v7 }
  0x18   :  { %325 = vmatprep.subr.bf16.mxu0 %v370_v8  ;;  %351 = vmatprep.subr.bf16.mxu1 %v370_v8  ;;  %p387_p3 = por %p386_p2, %p385_p1 }
  0x1a   :  { %p388_p4 = pnand %p387_p3, %p381_p0 }
  0x1b   :  { %326 = vmatpush3.bf16.msra.mxu0 %v370_v8  ;;  %359 = vmatpush3.bf16.msra.mxu1 %v370_v8 }
  0x1c   :  { %327 = vmatprep.subr.bf16.mxu0 %v371_v9  ;;  %352 = vmatprep.subr.bf16.mxu1 %v371_v9 }
  0x1f   :  { %328 = vmatpush3.bf16.msra.mxu0 %v371_v9  ;;  %360 = vmatpush3.bf16.msra.mxu1 %v371_v9 }
  0x22   :  { %330 = vmatmul.mubr.bf16.vlgmr.msra.gmra.mxu0 %v374_v10  ;;  %338 = vmatmul.mubr.bf16.vlgmr.msra.gmra.mxu1 %v375_v11 }
  0x23   :  { %333 = vmatprep.mubr.bf16.mxu0 %v376_v12  ;;  %341 = vmatprep.mubr.bf16.mxu1 %v377_v13 }
  0x2a   :  { %334 = vmatmul.mubr.bf16.gmra.mxu0 %v378_v14  ;;  %342 = vmatmul.mubr.bf16.gmra.mxu1 %v379_v15 }
  0xe2   :  { %v331_v17 = vpop.f32.mrf.mxu0  ;;  %v339_v18 = vpop.f32.mrf.mxu1 }
  0xe3   :  { %v194_v19 = vadd.f32 %v331_v17, %v280_v16  ;;  %v226_v20 = vadd.f32 %v339_v18, %v280_v16 }
  0xe4   :  { %v185_v21 = vpop.f32.mrf.mxu0  ;;  %v217_v22 = vpop.f32.mrf.mxu1 }
  0xe5   :  { %250 = vst [vmem:[#allocation2 + $0x10] sm:$0xff] %v194_v19  ;;  %258 = vst [vmem:[#allocation2 + $0x50] sm:$0xff] %v226_v20  ;;  %v186_v23 = vadd.f32 %v280_v16, %v185_v21  ;;  %v218_v24 = vadd.f32 %v280_v16, %v217_v22 }
  0xe6   :  { %v332_v25 = vpop.f32.mrf.mxu0  ;;  %v340_v26 = vpop.f32.mrf.mxu1 }
  0xe7   :  { %248 = vst [vmem:[#allocation2] sm:$0xff] %v186_v23  ;;  %256 = vst [vmem:[#allocation2 + $0x40] sm:$0xff] %v218_v24  ;;  %v197_v27 = vadd.f32 %v332_v25, %v280_v16  ;;  %v229_v28 = vadd.f32 %v340_v26, %v280_v16 }
  0xe8   :  { %v188_v29 = vpop.f32.mrf.mxu0  ;;  %v220_v30 = vpop.f32.mrf.mxu1 }
  0xe9   :  { %251 = vst [vmem:[#allocation2 + $0x18] sm:$0xff] %v197_v27  ;;  %259 = vst [vmem:[#allocation2 + $0x58] sm:$0xff] %v229_v28  ;;  %v189_v31 = vadd.f32 %v280_v16, %v188_v29  ;;  %v221_v32 = vadd.f32 %v280_v16, %v220_v30 }
  0xea   :  { %v335_v33 = vpop.f32.mrf.mxu0  ;;  %v343_v34 = vpop.f32.mrf.mxu1 }
  0xeb   :  { %249 = vst [vmem:[#allocation2 + $0x8] sm:$0xff] %v189_v31  ;;  %257 = vst [vmem:[#allocation2 + $0x48] sm:$0xff] %v221_v32  ;;  %v210_v35 = vadd.f32 %v335_v33, %v280_v16  ;;  %v242_v36 = vadd.f32 %v343_v34, %v280_v16 }
  0xec   :  { %v201_v37 = vpop.f32.mrf.mxu0  ;;  %v233_v38 = vpop.f32.mrf.mxu1 }
  0xed   :  { %254 = vst [vmem:[#allocation2 + $0x30] sm:$0xff] %v210_v35  ;;  %262 = vst [vmem:[#allocation2 + $0x70] sm:$0xff] %v242_v36  ;;  %v202_v39 = vadd.f32 %v280_v16, %v201_v37  ;;  %v234_v40 = vadd.f32 %v280_v16, %v233_v38 }
  0xee   :  { %v336_v41 = vpop.f32.mrf.mxu0  ;;  %v344_v42 = vpop.f32.mrf.mxu1 }
  0xef   :  { %252 = vst [vmem:[#allocation2 + $0x20] sm:$0xff] %v202_v39  ;;  %260 = vst [vmem:[#allocation2 + $0x60] sm:$0xff] %v234_v40  ;;  %v213_v43 = vadd.f32 %v336_v41, %v280_v16  ;;  %v245_v44 = vadd.f32 %v344_v42, %v280_v16 }
  0xf0   :  { %v204_v45 = vpop.f32.mrf.mxu0  ;;  %v236_v46 = vpop.f32.mrf.mxu1 }
  0xf1   :  { %255 = vst [vmem:[#allocation2 + $0x38] sm:$0xff] %v213_v43  ;;  %263 = vst [vmem:[#allocation2 + $0x78] sm:$0xff] %v245_v44  ;;  %v205_v47 = vadd.f32 %v280_v16, %v204_v45  ;;  %v237_v48 = vadd.f32 %v280_v16, %v236_v46 }
  0xf3   :  { %253 = vst [vmem:[#allocation2 + $0x28] sm:$0xff] %v205_v47  ;;  %261 = vst [vmem:[#allocation2 + $0x68] sm:$0xff] %v237_v48 }
  0xf4   :  { %391 = shalt.err (!%p388_p4)
}
  0xf5   :  { %s403_s19 = smov 128   ;;  %s404_s20 = smov 8  }
  0xf6   :  { %275 = dma.vmem_to_hbm [thread:$0]  %s270_s2, 2048, %s482_s3, [#allocation3], %s403_s19, %s403_s19, %s404_s20  }
  0xf7   :  { %400 = dma.done.wait [#allocation3], 2048  }
  0xf8   :  { %401 = vsyncadd [#allocation3], 4294965248 }
  0xf9   :  { %279 = vsyncpa [#allocation3], 1 }

// kernel: lstm_model_forward.5
= control target key start
LH: loop header
LB: loop body
LE: loop exit
PB: predicated region body
PF: predicated region fallthrough
CT: control target
= control target key end

     0   :  { %v684_v1 = vmov 0   ;;  %v65_v41 = vlaneseq  ;;  %s1108_s1 = inlined_call_operand.vmem [shape: bf16[128,512], index: 1, kind: input, shape index: {}]   ;;  %s1109_s0 = inlined_call_operand.vmem [shape: bf16[128,128], index: 0, kind: input, shape index: {}]   ;;  %s1110_s2 = inlined_call_operand.vmem [shape: f32[1,512], index: 2, kind: input, shape index: {}]   ;;  %s1111_s3 = inlined_call_operand.vmem [shape: f32[128,512], index: 3, kind: output, shape index: {}]  }
   0x1   :  { %v628_v0 = vld [vmem:[%s1108_s1 + $0xe4] ss:$16 sps:$4 sm:$0xff]   ;;  %325 = vmatprep.mubr.bf16.mxu0 %v684_v1  ;;  %438 = vmatprep.mubr.bf16.mxu1 %v684_v1  ;;  %v630_v2 = vld [vmem:[%s1108_s1 + $0xec] ss:$16 sps:$4 sm:$0xff]   ;;  %v632_v3 = vld [vmem:[%s1108_s1 + $0xe0] ss:$16 sps:$4 sm:$0xff]  }
   0x2   :  { %293 = vmatprep.subr.bf16.mxu0 %v628_v0  ;;  %v633_v4 = vld [vmem:[%s1108_s1 + $0xe8] ss:$16 sps:$4 sm:$0xff]   ;;  %406 = vmatprep.subr.bf16.mxu1 %v630_v2  ;;  %v634_v5 = vld [vmem:[%s1108_s1 + $0xc4] ss:$16 sps:$4 sm:$0xff]   ;;  %v636_v6 = vld [vmem:[%s1108_s1 + $0xcc] ss:$16 sps:$4 sm:$0xff]  }
   0x3   :  { %294 = vmatpush1.bf16.msra.mxu0 %v632_v3  ;;  %407 = vmatpush1.bf16.msra.mxu1 %v633_v4  ;;  %v638_v7 = vld [vmem:[%s1108_s1 + $0xc0] ss:$16 sps:$4 sm:$0xff]   ;;  %v639_v8 = vld [vmem:[%s1108_s1 + $0xc8] ss:$16 sps:$4 sm:$0xff]   ;;  %v640_v9 = vld [vmem:[%s1108_s1 + $0xa4] ss:$16 sps:$4 sm:$0xff]  }
   0x4   :  { %295 = vmatprep.subr.bf16.mxu0 %v634_v5  ;;  %408 = vmatprep.subr.bf16.mxu1 %v636_v6  ;;  %v642_v10 = vld [vmem:[%s1108_s1 + $0xac] ss:$16 sps:$4 sm:$0xff]   ;;  %v644_v11 = vld [vmem:[%s1108_s1 + $0xa0] ss:$16 sps:$4 sm:$0xff]   ;;  %v645_v12 = vld [vmem:[%s1108_s1 + $0xa8] ss:$16 sps:$4 sm:$0xff]  }
   0x5   :  { %v646_v13 = vld [vmem:[%s1108_s1 + $0x84] ss:$16 sps:$4 sm:$0xff]   ;;  %v648_v14 = vld [vmem:[%s1108_s1 + $0x8c] ss:$16 sps:$4 sm:$0xff]   ;;  %v650_v15 = vld [vmem:[%s1108_s1 + $0x80] ss:$16 sps:$4 sm:$0xff]  }
   0x6   :  { %v651_v16 = vld [vmem:[%s1108_s1 + $0x88] ss:$16 sps:$4 sm:$0xff]   ;;  %v652_v17 = vld [vmem:[%s1108_s1 + $0x64] ss:$16 sps:$4 sm:$0xff]   ;;  %v654_v18 = vld [vmem:[%s1108_s1 + $0x6c] ss:$16 sps:$4 sm:$0xff]  }
   0x7   :  { %296 = vmatpush1.bf16.msra.mxu0 %v638_v7  ;;  %409 = vmatpush1.bf16.msra.mxu1 %v639_v8  ;;  %v656_v19 = vld [vmem:[%s1108_s1 + $0x60] ss:$16 sps:$4 sm:$0xff]   ;;  %v657_v20 = vld [vmem:[%s1108_s1 + $0x68] ss:$16 sps:$4 sm:$0xff]   ;;  %v658_v21 = vld [vmem:[%s1108_s1 + $0x44] ss:$16 sps:$4 sm:$0xff]  }
   0x8   :  { %297 = vmatprep.subr.bf16.mxu0 %v640_v9  ;;  %410 = vmatprep.subr.bf16.mxu1 %v642_v10  ;;  %v660_v22 = vld [vmem:[%s1108_s1 + $0x4c] ss:$16 sps:$4 sm:$0xff]   ;;  %v662_v23 = vld [vmem:[%s1108_s1 + $0x40] ss:$16 sps:$4 sm:$0xff]   ;;  %v663_v24 = vld [vmem:[%s1108_s1 + $0x48] ss:$16 sps:$4 sm:$0xff]  }
   0x9   :  { %v664_v25 = vld [vmem:[%s1108_s1 + $0x24] ss:$16 sps:$4 sm:$0xff]   ;;  %v666_v26 = vld [vmem:[%s1108_s1 + $0x2c] ss:$16 sps:$4 sm:$0xff]   ;;  %v668_v27 = vld [vmem:[%s1108_s1 + $0x20] ss:$16 sps:$4 sm:$0xff]  }
   0xa   :  { %v669_v28 = vld [vmem:[%s1108_s1 + $0x28] ss:$16 sps:$4 sm:$0xff]   ;;  %v670_v29 = vld [vmem:[%s1108_s1 + $0x4] ss:$16 sps:$4 sm:$0xff]   ;;  %v672_v30 = vld [vmem:[%s1108_s1 + $0xc] ss:$16 sps:$4 sm:$0xff]  }
   0xb   :  { %298 = vmatpush1.bf16.msra.mxu0 %v644_v11  ;;  %411 = vmatpush1.bf16.msra.mxu1 %v645_v12  ;;  %v674_v31 = vld [vmem:[%s1108_s1] ss:$16 sps:$4 sm:$0xff]   ;;  %v675_v32 = vld [vmem:[%s1108_s1 + $0x8] ss:$16 sps:$4 sm:$0xff]   ;;  %v66_v42 = vshrl.u32 %v65_v41, 7 }
   0xc   :  { %299 = vmatprep.subr.bf16.mxu0 %v646_v13  ;;  %412 = vmatprep.subr.bf16.mxu1 %v648_v14  ;;  %v676_v33 = vld [vmem:[%s1109_s0] sm:$0xff]   ;;  %v677_v34 = vld [vmem:[%s1109_s0 + $0x8] sm:$0xff]   ;;  %v678_v35 = vld [vmem:[%s1109_s0 + $0x10] sm:$0xff]  }
   0xd   :  { %v679_v36 = vld [vmem:[%s1109_s0 + $0x18] sm:$0xff]   ;;  %v680_v37 = vld [vmem:[%s1109_s0 + $0x20] sm:$0xff]   ;;  %v681_v38 = vld [vmem:[%s1109_s0 + $0x28] sm:$0xff]   ;;  %v67_v43 = vsub.s32 0, %v66_v42  ;;  %v75_v44 = vsub.s32 2, %v66_v42  ;;  %v71_v46 = vsub.s32 1, %v66_v42 }
   0xe   :  { %v682_v39 = vld [vmem:[%s1109_s0 + $0x30] sm:$0xff]   ;;  %v683_v40 = vld [vmem:[%s1109_s0 + $0x38] sm:$0xff]   ;;  %v63_v45 = vld [vmem:[%s1110_s2] sm:$0xf]  ;;  %v79_v47 = vsub.s32 3, %v66_v42 }
   0xf   :  { %300 = vmatpush1.bf16.msra.mxu0 %v650_v15  ;;  %413 = vmatpush1.bf16.msra.mxu1 %v651_v16  ;;  %v844_v48 = vrot.slane %v63_v45, %v67_v43  ;;  %v846_v49 = vrot.slane %v63_v45, %v75_v44  ;;  %v848_v50 = vrot.slane %v63_v45, %v71_v46 }
  0x10   :  { %301 = vmatprep.subr.bf16.mxu0 %v652_v17  ;;  %414 = vmatprep.subr.bf16.mxu1 %v654_v18  ;;  %v850_v51 = vrot.slane %v63_v45, %v79_v47 }
  0x13   :  { %302 = vmatpush1.bf16.msra.mxu0 %v656_v19  ;;  %415 = vmatpush1.bf16.msra.mxu1 %v657_v20 }
  0x14   :  { %303 = vmatprep.subr.bf16.mxu0 %v658_v21  ;;  %416 = vmatprep.subr.bf16.mxu1 %v660_v22 }
  0x17   :  { %304 = vmatpush1.bf16.msra.mxu0 %v662_v23  ;;  %417 = vmatpush1.bf16.msra.mxu1 %v663_v24 }
  0x18   :  { %305 = vmatprep.subr.bf16.mxu0 %v664_v25  ;;  %418 = vmatprep.subr.bf16.mxu1 %v666_v26 }
  0x1b   :  { %306 = vmatpush1.bf16.msra.mxu0 %v668_v27  ;;  %419 = vmatpush1.bf16.msra.mxu1 %v669_v28 }
  0x1c   :  { %307 = vmatprep.subr.bf16.mxu0 %v670_v29  ;;  %420 = vmatprep.subr.bf16.mxu1 %v672_v30 }
  0x1f   :  { %308 = vmatpush1.bf16.msra.mxu0 %v674_v31  ;;  %421 = vmatpush1.bf16.msra.mxu1 %v675_v32 }
  0x22   :  { %326 = vmatmul.mubr.bf16.vlgmr.msra.gmra.mxu0 %v676_v33  ;;  %439 = vmatmul.mubr.bf16.vlgmr.msra.gmra.mxu1 %v676_v33 }
  0x23   :  { %335 = vmatprep.mubr.bf16.mxu0 %v684_v1  ;;  %448 = vmatprep.mubr.bf16.mxu1 %v684_v1 }
  0x2a   :  { %336 = vmatmul.mubr.bf16.gmra.mxu0 %v677_v34  ;;  %449 = vmatmul.mubr.bf16.gmra.mxu1 %v677_v34 }
  0x2b   :  { %345 = vmatprep.mubr.bf16.mxu0 %v684_v1  ;;  %458 = vmatprep.mubr.bf16.mxu1 %v684_v1 }
  0x32   :  { %346 = vmatmul.mubr.bf16.gmra.mxu0 %v678_v35  ;;  %459 = vmatmul.mubr.bf16.gmra.mxu1 %v678_v35 }
  0x33   :  { %355 = vmatprep.mubr.bf16.mxu0 %v684_v1  ;;  %468 = vmatprep.mubr.bf16.mxu1 %v684_v1 }
  0x3a   :  { %356 = vmatmul.mubr.bf16.gmra.mxu0 %v679_v36  ;;  %469 = vmatmul.mubr.bf16.gmra.mxu1 %v679_v36 }
  0x3b   :  { %365 = vmatprep.mubr.bf16.mxu0 %v684_v1  ;;  %478 = vmatprep.mubr.bf16.mxu1 %v684_v1 }
  0x42   :  { %366 = vmatmul.mubr.bf16.gmra.mxu0 %v680_v37  ;;  %479 = vmatmul.mubr.bf16.gmra.mxu1 %v680_v37 }
  0x43   :  { %375 = vmatprep.mubr.bf16.mxu0 %v684_v1  ;;  %488 = vmatprep.mubr.bf16.mxu1 %v684_v1 }
  0x4a   :  { %376 = vmatmul.mubr.bf16.gmra.mxu0 %v681_v38  ;;  %489 = vmatmul.mubr.bf16.gmra.mxu1 %v681_v38 }
  0x4b   :  { %385 = vmatprep.mubr.bf16.mxu0 %v684_v1  ;;  %498 = vmatprep.mubr.bf16.mxu1 %v684_v1 }
  0x52   :  { %386 = vmatmul.mubr.bf16.gmra.mxu0 %v682_v39  ;;  %499 = vmatmul.mubr.bf16.gmra.mxu1 %v682_v39 }
  0x53   :  { %395 = vmatprep.mubr.bf16.mxu0 %v684_v1  ;;  %508 = vmatprep.mubr.bf16.mxu1 %v684_v1 }
  0x5a   :  { %396 = vmatmul.mubr.bf16.gmra.mxu0 %v683_v40  ;;  %509 = vmatmul.mubr.bf16.gmra.mxu1 %v683_v40 }
  0xe2   :  { %v327_v52 = vpop.f32.mrf.mxu0  ;;  %v440_v53 = vpop.f32.mrf.mxu1 }
  0xe3   :  { %v328_v54 = vadd.f32 %v327_v52, %v844_v48  ;;  %v441_v55 = vadd.f32 %v440_v53, %v846_v49 }
  0xe4   :  { %v329_v56 = vpop.f32.mrf.mxu0  ;;  %v442_v57 = vpop.f32.mrf.mxu1 }
  0xe5   :  { %519 = vst [vmem:[%s1111_s3] sm:$0xff] %v328_v54  ;;  %521 = vst [vmem:[%s1111_s3 + $0x10] sm:$0xff] %v441_v55  ;;  %v330_v58 = vadd.f32 %v329_v56, %v848_v50  ;;  %v443_v59 = vadd.f32 %v442_v57, %v850_v51 }
  0xe6   :  { %v331_v60 = vpop.f32.mrf.mxu0  ;;  %v444_v61 = vpop.f32.mrf.mxu1 }
  0xe7   :  { %520 = vst [vmem:[%s1111_s3 + $0x8] sm:$0xff] %v330_v58  ;;  %522 = vst [vmem:[%s1111_s3 + $0x18] sm:$0xff] %v443_v59  ;;  %v332_v62 = vadd.f32 %v331_v60, %v844_v48  ;;  %v445_v63 = vadd.f32 %v444_v61, %v846_v49 }
  0xe8   :  { %v333_v0 = vpop.f32.mrf.mxu0  ;;  %v446_v1 = vpop.f32.mrf.mxu1 }
  0xe9   :  { %523 = vst [vmem:[%s1111_s3 + $0x20] sm:$0xff] %v332_v62  ;;  %525 = vst [vmem:[%s1111_s3 + $0x30] sm:$0xff] %v445_v63  ;;  %v334_v2 = vadd.f32 %v333_v0, %v848_v50  ;;  %v447_v3 = vadd.f32 %v446_v1, %v850_v51 }
  0xea   :  { %v337_v4 = vpop.f32.mrf.mxu0  ;;  %v450_v5 = vpop.f32.mrf.mxu1 }
  0xeb   :  { %524 = vst [vmem:[%s1111_s3 + $0x28] sm:$0xff] %v334_v2  ;;  %526 = vst [vmem:[%s1111_s3 + $0x38] sm:$0xff] %v447_v3  ;;  %v338_v6 = vadd.f32 %v337_v4, %v844_v48  ;;  %v451_v7 = vadd.f32 %v450_v5, %v846_v49 }
  0xec   :  { %v339_v8 = vpop.f32.mrf.mxu0  ;;  %v452_v9 = vpop.f32.mrf.mxu1 }
  0xed   :  { %527 = vst [vmem:[%s1111_s3 + $0x40] sm:$0xff] %v338_v6  ;;  %529 = vst [vmem:[%s1111_s3 + $0x50] sm:$0xff] %v451_v7  ;;  %v340_v10 = vadd.f32 %v339_v8, %v848_v50  ;;  %v453_v11 = vadd.f32 %v452_v9, %v850_v51 }
  0xee   :  { %v341_v12 = vpop.f32.mrf.mxu0  ;;  %v454_v13 = vpop.f32.mrf.mxu1 }
  0xef   :  { %528 = vst [vmem:[%s1111_s3 + $0x48] sm:$0xff] %v340_v10  ;;  %530 = vst [vmem:[%s1111_s3 + $0x58] sm:$0xff] %v453_v11  ;;  %v342_v14 = vadd.f32 %v341_v12, %v844_v48  ;;  %v455_v15 = vadd.f32 %v454_v13, %v846_v49 }
  0xf0   :  { %v343_v16 = vpop.f32.mrf.mxu0  ;;  %v456_v17 = vpop.f32.mrf.mxu1 }
  0xf1   :  { %531 = vst [vmem:[%s1111_s3 + $0x60] sm:$0xff] %v342_v14  ;;  %533 = vst [vmem:[%s1111_s3 + $0x70] sm:$0xff] %v455_v15  ;;  %v344_v18 = vadd.f32 %v343_v16, %v848_v50  ;;  %v457_v19 = vadd.f32 %v456_v17, %v850_v51 }
  0xf2   :  { %v347_v20 = vpop.f32.mrf.mxu0  ;;  %v460_v21 = vpop.f32.mrf.mxu1 }
  0xf3   :  { %532 = vst [vmem:[%s1111_s3 + $0x68] sm:$0xff] %v344_v18  ;;  %534 = vst [vmem:[%s1111_s3 + $0x78] sm:$0xff] %v457_v19  ;;  %v348_v22 = vadd.f32 %v347_v20, %v844_v48  ;;  %v461_v23 = vadd.f32 %v460_v21, %v846_v49 }
  0xf4   :  { %v349_v24 = vpop.f32.mrf.mxu0  ;;  %v462_v25 = vpop.f32.mrf.mxu1 }
  0xf5   :  { %535 = vst [vmem:[%s1111_s3 + $0x80] sm:$0xff] %v348_v22  ;;  %537 = vst [vmem:[%s1111_s3 + $0x90] sm:$0xff] %v461_v23  ;;  %v350_v26 = vadd.f32 %v349_v24, %v848_v50  ;;  %v463_v27 = vadd.f32 %v462_v25, %v850_v51 }
  0xf6   :  { %v351_v28 = vpop.f32.mrf.mxu0  ;;  %v464_v29 = vpop.f32.mrf.mxu1 }
  0xf7   :  { %536 = vst [vmem:[%s1111_s3 + $0x88] sm:$0xff] %v350_v26  ;;  %538 = vst [vmem:[%s1111_s3 + $0x98] sm:$0xff] %v463_v27  ;;  %v352_v30 = vadd.f32 %v351_v28, %v844_v48  ;;  %v465_v31 = vadd.f32 %v464_v29, %v846_v49 }
  0xf8   :  { %v353_v32 = vpop.f32.mrf.mxu0  ;;  %v466_v33 = vpop.f32.mrf.mxu1 }
  0xf9   :  { %539 = vst [vmem:[%s1111_s3 + $0xa0] sm:$0xff] %v352_v30  ;;  %541 = vst [vmem:[%s1111_s3 + $0xb0] sm:$0xff] %v465_v31  ;;  %v354_v34 = vadd.f32 %v353_v32, %v848_v50  ;;  %v467_v35 = vadd.f32 %v466_v33, %v850_v51 }
  0xfa   :  { %v357_v36 = vpop.f32.mrf.mxu0  ;;  %v470_v37 = vpop.f32.mrf.mxu1 }
  0xfb   :  { %540 = vst [vmem:[%s1111_s3 + $0xa8] sm:$0xff] %v354_v34  ;;  %542 = vst [vmem:[%s1111_s3 + $0xb8] sm:$0xff] %v467_v35  ;;  %v358_v38 = vadd.f32 %v357_v36, %v844_v48  ;;  %v471_v39 = vadd.f32 %v470_v37, %v846_v49 }
  0xfc   :  { %v359_v40 = vpop.f32.mrf.mxu0  ;;  %v472_v41 = vpop.f32.mrf.mxu1 }
  0xfd   :  { %543 = vst [vmem:[%s1111_s3 + $0xc0] sm:$0xff] %v358_v38  ;;  %545 = vst [vmem:[%s1111_s3 + $0xd0] sm:$0xff] %v471_v39  ;;  %v360_v42 = vadd.f32 %v359_v40, %v848_v50  ;;  %v473_v43 = vadd.f32 %v472_v41, %v850_v51 }
  0xfe   :  { %v361_v44 = vpop.f32.mrf.mxu0  ;;  %v474_v45 = vpop.f32.mrf.mxu1 }
  0xff   :  { %544 = vst [vmem:[%s1111_s3 + $0xc8] sm:$0xff] %v360_v42  ;;  %546 = vst [vmem:[%s1111_s3 + $0xd8] sm:$0xff] %v473_v43  ;;  %v362_v46 = vadd.f32 %v361_v44, %v844_v48  ;;  %v475_v47 = vadd.f32 %v474_v45, %v846_v49 }
 0x100   :  { %v363_v52 = vpop.f32.mrf.mxu0  ;;  %v476_v53 = vpop.f32.mrf.mxu1 }
 0x101   :  { %547 = vst [vmem:[%s1111_s3 + $0xe0] sm:$0xff] %v362_v46  ;;  %549 = vst [vmem:[%s1111_s3 + $0xf0] sm:$0xff] %v475_v47  ;;  %v364_v54 = vadd.f32 %v363_v52, %v848_v50  ;;  %v477_v55 = vadd.f32 %v476_v53, %v850_v51 }
 0x102   :  { %v367_v56 = vpop.f32.mrf.mxu0  ;;  %v480_v57 = vpop.f32.mrf.mxu1 }
 0x103   :  { %548 = vst [vmem:[%s1111_s3 + $0xe8] sm:$0xff] %v364_v54  ;;  %550 = vst [vmem:[%s1111_s3 + $0xf8] sm:$0xff] %v477_v55  ;;  %v368_v58 = vadd.f32 %v367_v56, %v844_v48  ;;  %v481_v59 = vadd.f32 %v480_v57, %v846_v49 }
 0x104   :  { %v369_v60 = vpop.f32.mrf.mxu0  ;;  %v482_v61 = vpop.f32.mrf.mxu1 }
 0x105   :  { %551 = vst [vmem:[%s1111_s3 + $0x100] sm:$0xff] %v368_v58  ;;  %553 = vst [vmem:[%s1111_s3 + $0x110] sm:$0xff] %v481_v59  ;;  %v370_v62 = vadd.f32 %v369_v60, %v848_v50  ;;  %v483_v63 = vadd.f32 %v482_v61, %v850_v51 }
 0x106   :  { %v371_v0 = vpop.f32.mrf.mxu0  ;;  %v484_v1 = vpop.f32.mrf.mxu1 }
 0x107   :  { %552 = vst [vmem:[%s1111_s3 + $0x108] sm:$0xff] %v370_v62  ;;  %554 = vst [vmem:[%s1111_s3 + $0x118] sm:$0xff] %v483_v63  ;;  %v372_v2 = vadd.f32 %v371_v0, %v844_v48  ;;  %v485_v3 = vadd.f32 %v484_v1, %v846_v49 }
 0x108   :  { %v373_v4 = vpop.f32.mrf.mxu0  ;;  %v486_v5 = vpop.f32.mrf.mxu1 }
 0x109   :  { %555 = vst [vmem:[%s1111_s3 + $0x120] sm:$0xff] %v372_v2  ;;  %557 = vst [vmem:[%s1111_s3 + $0x130] sm:$0xff] %v485_v3  ;;  %v374_v6 = vadd.f32 %v373_v4, %v848_v50  ;;  %v487_v7 = vadd.f32 %v486_v5, %v850_v51 }
 0x10a   :  { %v377_v8 = vpop.f32.mrf.mxu0  ;;  %v490_v9 = vpop.f32.mrf.mxu1 }
 0x10b   :  { %556 = vst [vmem:[%s1111_s3 + $0x128] sm:$0xff] %v374_v6  ;;  %558 = vst [vmem:[%s1111_s3 + $0x138] sm:$0xff] %v487_v7  ;;  %v378_v10 = vadd.f32 %v377_v8, %v844_v48  ;;  %v491_v11 = vadd.f32 %v490_v9, %v846_v49 }
 0x10c   :  { %v379_v12 = vpop.f32.mrf.mxu0  ;;  %v492_v13 = vpop.f32.mrf.mxu1 }
 0x10d   :  { %559 = vst [vmem:[%s1111_s3 + $0x140] sm:$0xff] %v378_v10  ;;  %561 = vst [vmem:[%s1111_s3 + $0x150] sm:$0xff] %v491_v11  ;;  %v380_v14 = vadd.f32 %v379_v12, %v848_v50  ;;  %v493_v15 = vadd.f32 %v492_v13, %v850_v51 }
 0x10e   :  { %v381_v16 = vpop.f32.mrf.mxu0  ;;  %v494_v17 = vpop.f32.mrf.mxu1 }
 0x10f   :  { %560 = vst [vmem:[%s1111_s3 + $0x148] sm:$0xff] %v380_v14  ;;  %562 = vst [vmem:[%s1111_s3 + $0x158] sm:$0xff] %v493_v15  ;;  %v382_v18 = vadd.f32 %v381_v16, %v844_v48  ;;  %v495_v19 = vadd.f32 %v494_v17, %v846_v49 }
 0x110   :  { %v383_v20 = vpop.f32.mrf.mxu0  ;;  %v496_v21 = vpop.f32.mrf.mxu1 }
 0x111   :  { %563 = vst [vmem:[%s1111_s3 + $0x160] sm:$0xff] %v382_v18  ;;  %565 = vst [vmem:[%s1111_s3 + $0x170] sm:$0xff] %v495_v19  ;;  %v384_v22 = vadd.f32 %v383_v20, %v848_v50  ;;  %v497_v23 = vadd.f32 %v496_v21, %v850_v51 }
 0x112   :  { %v387_v24 = vpop.f32.mrf.mxu0  ;;  %v500_v25 = vpop.f32.mrf.mxu1 }
 0x113   :  { %564 = vst [vmem:[%s1111_s3 + $0x168] sm:$0xff] %v384_v22  ;;  %566 = vst [vmem:[%s1111_s3 + $0x178] sm:$0xff] %v497_v23  ;;  %v388_v26 = vadd.f32 %v387_v24, %v844_v48  ;;  %v501_v27 = vadd.f32 %v500_v25, %v846_v49 }
 0x114   :  { %v389_v28 = vpop.f32.mrf.mxu0  ;;  %v502_v29 = vpop.f32.mrf.mxu1 }
 0x115   :  { %567 = vst [vmem:[%s1111_s3 + $0x180] sm:$0xff] %v388_v26  ;;  %569 = vst [vmem:[%s1111_s3 + $0x190] sm:$0xff] %v501_v27  ;;  %v390_v30 = vadd.f32 %v389_v28, %v848_v50  ;;  %v503_v31 = vadd.f32 %v502_v29, %v850_v51 }
 0x116   :  { %v391_v32 = vpop.f32.mrf.mxu0  ;;  %v504_v33 = vpop.f32.mrf.mxu1 }
 0x117   :  { %568 = vst [vmem:[%s1111_s3 + $0x188] sm:$0xff] %v390_v30  ;;  %570 = vst [vmem:[%s1111_s3 + $0x198] sm:$0xff] %v503_v31  ;;  %v392_v34 = vadd.f32 %v391_v32, %v844_v48  ;;  %v505_v35 = vadd.f32 %v504_v33, %v846_v49 }
 0x118   :  { %v393_v36 = vpop.f32.mrf.mxu0  ;;  %v506_v37 = vpop.f32.mrf.mxu1 }
 0x119   :  { %571 = vst [vmem:[%s1111_s3 + $0x1a0] sm:$0xff] %v392_v34  ;;  %573 = vst [vmem:[%s1111_s3 + $0x1b0] sm:$0xff] %v505_v35  ;;  %v394_v38 = vadd.f32 %v393_v36, %v848_v50  ;;  %v507_v39 = vadd.f32 %v506_v37, %v850_v51 }
 0x11a   :  { %v397_v40 = vpop.f32.mrf.mxu0  ;;  %v510_v41 = vpop.f32.mrf.mxu1 }
 0x11b   :  { %572 = vst [vmem:[%s1111_s3 + $0x1a8] sm:$0xff] %v394_v38  ;;  %574 = vst [vmem:[%s1111_s3 + $0x1b8] sm:$0xff] %v507_v39  ;;  %v398_v42 = vadd.f32 %v397_v40, %v844_v48  ;;  %v511_v43 = vadd.f32 %v510_v41, %v846_v49 }
 0x11c   :  { %v399_v44 = vpop.f32.mrf.mxu0  ;;  %v512_v45 = vpop.f32.mrf.mxu1 }
 0x11d   :  { %575 = vst [vmem:[%s1111_s3 + $0x1c0] sm:$0xff] %v398_v42  ;;  %577 = vst [vmem:[%s1111_s3 + $0x1d0] sm:$0xff] %v511_v43  ;;  %v400_v46 = vadd.f32 %v399_v44, %v848_v50  ;;  %v513_v47 = vadd.f32 %v512_v45, %v850_v51 }
 0x11e   :  { %v401_v52 = vpop.f32.mrf.mxu0  ;;  %v514_v53 = vpop.f32.mrf.mxu1 }
 0x11f   :  { %576 = vst [vmem:[%s1111_s3 + $0x1c8] sm:$0xff] %v400_v46  ;;  %578 = vst [vmem:[%s1111_s3 + $0x1d8] sm:$0xff] %v513_v47  ;;  %v402_v54 = vadd.f32 %v401_v52, %v844_v48  ;;  %v515_v55 = vadd.f32 %v514_v53, %v846_v49 }
 0x120   :  { %v403_v56 = vpop.f32.mrf.mxu0  ;;  %v516_v57 = vpop.f32.mrf.mxu1 }
 0x121   :  { %579 = vst [vmem:[%s1111_s3 + $0x1e0] sm:$0xff] %v402_v54  ;;  %581 = vst [vmem:[%s1111_s3 + $0x1f0] sm:$0xff] %v515_v55  ;;  %v404_v58 = vadd.f32 %v403_v56, %v848_v50  ;;  %v517_v59 = vadd.f32 %v516_v57, %v850_v51 }
 0x123   :  { %580 = vst [vmem:[%s1111_s3 + $0x1e8] sm:$0xff] %v404_v58  ;;  %582 = vst [vmem:[%s1111_s3 + $0x1f8] sm:$0xff] %v517_v59 }

// kernel: lstm_model_forward.6
= control target key start
LH: loop header
LB: loop body
LE: loop exit
PB: predicated region body
PF: predicated region fallthrough
CT: control target
= control target key end

     0   :  { %s1706_s21 = smov 0   ;;  %s2295_s0 = inlined_call_operand.vmem [shape: f32[16,8,512], index: 0, kind: input, shape index: {}]   ;;  %s2296_s1 = inlined_call_operand.vmem [shape: bf16[128,512], index: 1, kind: input, shape index: {}]   ;;  %s2297_s2 = inlined_call_operand.vmem [shape: f32[8,128], index: 2, kind: input, shape index: {}]   ;;  %s2298_s3 = inlined_call_operand.vmem [shape: f32[8,128], index: 3, kind: input, shape index: {}]   ;;  %s2299_s4 = inlined_call_operand.vmem [shape: f32[16,8,128], index: 4, kind: output, shape index: {0}]   ;;  %s2300_s5 = inlined_call_operand.vmem [shape: f32[8,128], index: 5, kind: output, shape index: {1}]   ;;  %s2301_s6 = inlined_call_operand.vmem [shape: f32[8,128], index: 6, kind: output, shape index: {2}]  }
   0x1 LB: > { %s1420_s22 = sadd.s32 4294967295, %s1668_s21   ;;  %p1424_p0 = scmp.ge.s32.totalorder %s1668_s21, 1  ;;  %s1668_s21 = sphi %s1706_s21, %s17_s21  }
   0x2   : > { %p209_p1 = scmp.lt.s32.totalorder %s1668_s21, 3 }
   0x4   : > { %p210_p2 = pnand %p1424_p0, %p209_p1 }
   0x5   : > { %s1425_s23 = sshll.u32 (!%p210_p2), %s1420_s22, 3  ;;  %p1430_p4 = scmp.ne.s32.totalorder (!%p210_p2), %s1420_s22, 0 }
   0x6   : > { %213 = sbr.rel (%p210_p2) target bundleno = 1964 (0x7ac), region = 36  ;;  %p241_p3 = scmp.lt.s32.totalorder (!%p210_p2), %s1425_s23, 15 }
   0xb   : > { %s2303_s23 = smov (!%p241_p3, %s1425_s23), 15  ;;  %257 = sbr.rel (%p1430_p4) target bundleno = 19 (0x13), region = 40 }
   0xc   : > { %s1500_s24 = sshll.u32 %s2303_s23, 5  ;;  %s1429_s25 = sshll.u32 %s2303_s23, 3 }
   0xd   : > { %s1717_s28 = scalar_lea.vmem %s2295_s0, %s1500_s24  ;;  %s1722_s7 = scalar_lea.vmem %s2299_s4, %s1429_s25 }
  0x10   : > { %v258_v0 = vld [vmem:[%s2297_s2] sm:$0xff] }
  0x11   : > { %v260_v1 = vld [vmem:[%s2298_s3] sm:$0xff]  ;;  %259 = vst [vmem:[%s2300_s5] sm:$0xff] %v258_v0 }
  0x12   : > { %261 = vst [vmem:[%s2301_s6] sm:$0xff] %v260_v1 }
  0x13 PF: > { %v1739_v2 = vld [vmem:[%s2296_s1 + $0xe4] ss:$16 sps:$4 sm:$0xff]   ;;  %v1744_v3 = vld [vmem:[%s2296_s1 + $0xe0] ss:$16 sps:$4 sm:$0xff]   ;;  %v1670_v4 = vmov 0   ;;  %v297_v39 = vld [vmem:[%s1717_s28 + $0x8] sm:$0xff] }
  0x14   : > { %493 = vmatprep.mubr.bf16.mxu0 %v1670_v4  ;;  %534 = vmatprep.mubr.bf16.mxu1 %v1670_v4  ;;  %v1752_v5 = vld [vmem:[%s2296_s1 + $0xec] ss:$16 sps:$4 sm:$0xff]   ;;  %v1757_v6 = vld [vmem:[%s2296_s1 + $0xe8] ss:$16 sps:$4 sm:$0xff]   ;;  %v1763_v7 = vld [vmem:[%s2296_s1 + $0xc4] ss:$16 sps:$4 sm:$0xff]  }
  0x15   : > { %461 = vmatprep.subr.bf16.mxu0 %v1739_v2  ;;  %v1768_v8 = vld [vmem:[%s2296_s1 + $0xc0] ss:$16 sps:$4 sm:$0xff]   ;;  %502 = vmatprep.subr.bf16.mxu1 %v1752_v5  ;;  %v1774_v9 = vld [vmem:[%s2296_s1 + $0xcc] ss:$16 sps:$4 sm:$0xff]   ;;  %v1781_v10 = vld [vmem:[%s2296_s1 + $0xc8] ss:$16 sps:$4 sm:$0xff]  }
  0x16   : > { %462 = vmatpush1.bf16.msra.mxu0 %v1744_v3  ;;  %503 = vmatpush1.bf16.msra.mxu1 %v1757_v6  ;;  %v1787_v11 = vld [vmem:[%s2296_s1 + $0xa4] ss:$16 sps:$4 sm:$0xff]   ;;  %v1793_v12 = vld [vmem:[%s2296_s1 + $0xa0] ss:$16 sps:$4 sm:$0xff]   ;;  %v1798_v13 = vld [vmem:[%s2296_s1 + $0xac] ss:$16 sps:$4 sm:$0xff]  }
  0x17   : > { %463 = vmatprep.subr.bf16.mxu0 %v1763_v7  ;;  %504 = vmatprep.subr.bf16.mxu1 %v1774_v9  ;;  %v1804_v14 = vld [vmem:[%s2296_s1 + $0x84] ss:$16 sps:$4 sm:$0xff]   ;;  %v1810_v15 = vld [vmem:[%s2296_s1 + $0xa8] ss:$16 sps:$4 sm:$0xff]   ;;  %v1816_v16 = vld [vmem:[%s2296_s1 + $0x8c] ss:$16 sps:$4 sm:$0xff]  }
  0x18   : > { %v1822_v17 = vld [vmem:[%s2296_s1 + $0x80] ss:$16 sps:$4 sm:$0xff]   ;;  %v1828_v18 = vld [vmem:[%s2296_s1 + $0x64] ss:$16 sps:$4 sm:$0xff]   ;;  %v1834_v19 = vld [vmem:[%s2296_s1 + $0x88] ss:$16 sps:$4 sm:$0xff]  }
  0x19   : > { %v1840_v20 = vld [vmem:[%s2296_s1 + $0x6c] ss:$16 sps:$4 sm:$0xff]   ;;  %v1846_v21 = vld [vmem:[%s2296_s1 + $0x60] ss:$16 sps:$4 sm:$0xff]   ;;  %v1852_v22 = vld [vmem:[%s2296_s1 + $0x44] ss:$16 sps:$4 sm:$0xff]  }
  0x1a   : > { %464 = vmatpush1.bf16.msra.mxu0 %v1768_v8  ;;  %505 = vmatpush1.bf16.msra.mxu1 %v1781_v10  ;;  %v1858_v23 = vld [vmem:[%s2296_s1 + $0x68] ss:$16 sps:$4 sm:$0xff]   ;;  %v1864_v24 = vld [vmem:[%s2296_s1 + $0x4c] ss:$16 sps:$4 sm:$0xff]   ;;  %v1870_v25 = vld [vmem:[%s2296_s1 + $0x40] ss:$16 sps:$4 sm:$0xff]  }
  0x1b   : > { %465 = vmatprep.subr.bf16.mxu0 %v1787_v11  ;;  %506 = vmatprep.subr.bf16.mxu1 %v1798_v13  ;;  %v1876_v26 = vld [vmem:[%s2296_s1 + $0x24] ss:$16 sps:$4 sm:$0xff]   ;;  %v1882_v27 = vld [vmem:[%s2296_s1 + $0x48] ss:$16 sps:$4 sm:$0xff]   ;;  %v1888_v28 = vld [vmem:[%s2296_s1 + $0x2c] ss:$16 sps:$4 sm:$0xff]  }
  0x1c   : > { %v1894_v29 = vld [vmem:[%s2296_s1 + $0x20] ss:$16 sps:$4 sm:$0xff]   ;;  %v1900_v30 = vld [vmem:[%s2296_s1 + $0x4] ss:$16 sps:$4 sm:$0xff]   ;;  %v1906_v31 = vld [vmem:[%s2296_s1 + $0x28] ss:$16 sps:$4 sm:$0xff]  }
  0x1d   : > { %v1912_v32 = vld [vmem:[%s2296_s1 + $0xc] ss:$16 sps:$4 sm:$0xff]   ;;  %v1918_v33 = vld [vmem:[%s2296_s1] ss:$16 sps:$4 sm:$0xff]   ;;  %v1928_v35 = vld [vmem:[%s2296_s1 + $0x8] ss:$16 sps:$4 sm:$0xff]  }
  0x1e   : > { %466 = vmatpush1.bf16.msra.mxu0 %v1793_v12  ;;  %507 = vmatpush1.bf16.msra.mxu1 %v1810_v15  ;;  %v294_v34 = vld [vmem:[%s2300_s5] sm:$0xff]  ;;  %v298_v42 = vld [vmem:[%s1717_s28 + $0x10] sm:$0xff]  ;;  %v299_v53 = vld [vmem:[%s1717_s28 + $0x18] sm:$0xff] }
  0x1f   : > { %467 = vmatprep.subr.bf16.mxu0 %v1804_v14  ;;  %508 = vmatprep.subr.bf16.mxu1 %v1816_v16  ;;  %v300_v36 = vpack.c.bf16 %v294_v34, %v294_v34  ;;  %v296_v37 = vld [vmem:[%s1717_s28] sm:$0xff] }
  0x20   : > { %v295_v62 = vld [vmem:[%s2301_s6] sm:$0xff] }
  0x22   : > { %468 = vmatpush1.bf16.msra.mxu0 %v1822_v17  ;;  %509 = vmatpush1.bf16.msra.mxu1 %v1834_v19 }
  0x23   : > { %469 = vmatprep.subr.bf16.mxu0 %v1828_v18  ;;  %510 = vmatprep.subr.bf16.mxu1 %v1840_v20 }
  0x26   : > { %470 = vmatpush1.bf16.msra.mxu0 %v1846_v21  ;;  %511 = vmatpush1.bf16.msra.mxu1 %v1858_v23 }
  0x27   : > { %471 = vmatprep.subr.bf16.mxu0 %v1852_v22  ;;  %512 = vmatprep.subr.bf16.mxu1 %v1864_v24 }
  0x2a   : > { %472 = vmatpush1.bf16.msra.mxu0 %v1870_v25  ;;  %513 = vmatpush1.bf16.msra.mxu1 %v1882_v27 }
  0x2b   : > { %473 = vmatprep.subr.bf16.mxu0 %v1876_v26  ;;  %514 = vmatprep.subr.bf16.mxu1 %v1888_v28 }
  0x2e   : > { %474 = vmatpush1.bf16.msra.mxu0 %v1894_v29  ;;  %515 = vmatpush1.bf16.msra.mxu1 %v1906_v31 }
  0x2f   : > { %475 = vmatprep.subr.bf16.mxu0 %v1900_v30  ;;  %516 = vmatprep.subr.bf16.mxu1 %v1912_v32 }
  0x32   : > { %476 = vmatpush1.bf16.msra.mxu0 %v1918_v33  ;;  %517 = vmatpush1.bf16.msra.mxu1 %v1928_v35 }
  0x33   : > { %572 = vmatprep.subr.bf16.mxu0 %v1739_v2  ;;  %613 = vmatprep.subr.bf16.mxu1 %v1752_v5 }
  0x35   : > { %494 = vmatmul.mubr.bf16.vlgmr.msra.gmra.mxu0 %v300_v36  ;;  %535 = vmatmul.mubr.bf16.vlgmr.msra.gmra.mxu1 %v300_v36 }
  0x36   : > { %573 = vmatpush1.bf16.msra.mxu0 %v1744_v3  ;;  %604 = vmatprep.mubr.bf16.mxu0 %v1670_v4 }
  0x37   : > { %574 = vmatprep.subr.bf16.mxu0 %v1763_v7  ;;  %614 = vmatpush1.bf16.msra.mxu1 %v1757_v6 }
  0x38   : > { %645 = vmatprep.mubr.bf16.mxu1 %v1670_v4  ;;  %615 = vmatprep.subr.bf16.mxu1 %v1774_v9 }
  0x3a   : > { %575 = vmatpush1.bf16.msra.mxu0 %v1768_v8 }
  0x3b   : > { %576 = vmatprep.subr.bf16.mxu0 %v1787_v11  ;;  %616 = vmatpush1.bf16.msra.mxu1 %v1781_v10 }
  0x3c   : > { %617 = vmatprep.subr.bf16.mxu1 %v1798_v13 }
  0x3e   : > { %577 = vmatpush1.bf16.msra.mxu0 %v1793_v12 }
  0x3f   : > { %578 = vmatprep.subr.bf16.mxu0 %v1804_v14  ;;  %618 = vmatpush1.bf16.msra.mxu1 %v1810_v15 }
  0x40   : > { %619 = vmatprep.subr.bf16.mxu1 %v1816_v16 }
  0x42   : > { %579 = vmatpush1.bf16.msra.mxu0 %v1822_v17 }
  0x43   : > { %580 = vmatprep.subr.bf16.mxu0 %v1828_v18  ;;  %620 = vmatpush1.bf16.msra.mxu1 %v1834_v19 }
  0x44   : > { %621 = vmatprep.subr.bf16.mxu1 %v1840_v20 }
  0x46   : > { %581 = vmatpush1.bf16.msra.mxu0 %v1846_v21 }
  0x47   : > { %582 = vmatprep.subr.bf16.mxu0 %v1852_v22  ;;  %622 = vmatpush1.bf16.msra.mxu1 %v1858_v23 }
  0x48   : > { %623 = vmatprep.subr.bf16.mxu1 %v1864_v24 }
  0x4a   : > { %583 = vmatpush1.bf16.msra.mxu0 %v1870_v25 }
  0x4b   : > { %584 = vmatprep.subr.bf16.mxu0 %v1876_v26  ;;  %624 = vmatpush1.bf16.msra.mxu1 %v1882_v27 }
  0x4c   : > { %625 = vmatprep.subr.bf16.mxu1 %v1888_v28 }
  0x4e   : > { %585 = vmatpush1.bf16.msra.mxu0 %v1894_v29 }
  0x4f   : > { %586 = vmatprep.subr.bf16.mxu0 %v1900_v30  ;;  %626 = vmatpush1.bf16.msra.mxu1 %v1906_v31 }
  0x50   : > { %627 = vmatprep.subr.bf16.mxu1 %v1912_v32 }
  0x52   : > { %587 = vmatpush1.bf16.msra.mxu0 %v1918_v33 }
  0x53   : > { %684 = vmatprep.subr.bf16.mxu0 %v1739_v2  ;;  %628 = vmatpush1.bf16.msra.mxu1 %v1928_v35 }
  0x54   : > { %725 = vmatprep.subr.bf16.mxu1 %v1752_v5 }
  0xf5   : > { %v495_v38 = vpop.f32.mrf.mxu0  ;;  %v536_v43 = vpop.f32.mrf.mxu1 }
  0xf6   : > { %v543_v40 = vadd.f32 %v495_v38, %v296_v37  ;;  %v545_v49 = vadd.f32 %v536_v43, %v298_v42  ;;  %v1463_v42 = vld [vmem:[%s1717_s28 + $0x20] sm:$0xff] }
  0xf7   : > { %v497_v41 = vpop.f32.mrf.mxu0  ;;  %v538_v47 = vpop.f32.mrf.mxu1 }
  0xf8   : > { %v547_v44 = vmul.f32 0.5, %v543_v40  ;;  %v544_v45 = vadd.f32 %v497_v41, %v297_v39  ;;  %v546_v54 = vadd.f32 %v538_v47, %v299_v53 }
  0xf9   : > { %v499_v46 = vpop.f32.mrf.mxu0  ;;  %v540_v51 = vpop.f32.mrf.mxu1 }
  0xfa   : > { %1558 = vtanh.f32 %v547_v44  ;;  %v551_v48 = vmul.f32 0.5, %v544_v45  ;;  %v556_v55 = vmul.f32 0.5, %v546_v54  ;;  %v1464_v45 = vld [vmem:[%s1717_s28 + $0x28] sm:$0xff]  ;;  %v1465_v51 = vld [vmem:[%s1717_s28 + $0x30] sm:$0xff] }
  0xfb   : > { %v500_v50 = vpop.f32.mrf.mxu0  ;;  %v541_v52 = vpop.f32.mrf.mxu1 }
  0xfc   : > { %1560 = vtanh.f32 %v551_v48 }
  0xfd   : > { %1562 = vtanh.f32 %v545_v49 }
  0xfe   : > { %1564 = vtanh.f32 %v556_v55 }
 0x107   : > { %v1559_v56 = vpop.eup %1558 }
 0x108   : > { %v549_v57 = vmul.f32 0.5, %v1559_v56 }
 0x109   : > { %v1561_v58 = vpop.eup %1560 }
 0x10a   : > { %v550_v59 = vadd.f32 0.5, %v549_v57  ;;  %v553_v60 = vmul.f32 0.5, %v1561_v58  ;;  %v1563_v61 = vpop.eup %1562  ;;  %v1466_v58 = vld [vmem:[%s1717_s28 + $0x38] sm:$0xff] }
 0x10b   : > { %v1565_v36 = vpop.eup %1564 }
 0x10c   : > { %v554_v63 = vadd.f32 0.5, %v553_v60  ;;  %v561_v1 = vmul.f32 %v1563_v61, %v550_v59  ;;  %v558_v37 = vmul.f32 0.5, %v1565_v36 }
 0x10e   : > { %v560_v0 = vmul.f32 %v554_v63, %v295_v62  ;;  %v559_v38 = vadd.f32 0.5, %v558_v37 }
 0x110   : > { %v1976_v34 = vadd.f32 %v561_v1, %v560_v0 }
 0x112   : > { %1566 = vtanh.f32 %v1976_v34 }
 0x11f   : > { %v1567_v39 = vpop.eup %1566 }
 0x120   : > { %v564_v40 = vmul.f32 %v1567_v39, %v559_v38 }
 0x122   : > { %565 = vst [vmem:[%s1722_s7] sm:$0xff] %v564_v40  ;;  %v571_v41 = vpack.c.bf16 %v564_v40, %v564_v40 }
 0x124   : > { %605 = vmatmul.mubr.bf16.vlgmr.msra.gmra.mxu0 %v571_v41  ;;  %646 = vmatmul.mubr.bf16.vlgmr.msra.gmra.mxu1 %v571_v41 }
 0x125   : > { %685 = vmatpush1.bf16.msra.mxu0 %v1744_v3  ;;  %726 = vmatpush1.bf16.msra.mxu1 %v1757_v6 }
 0x126   : > { %686 = vmatprep.subr.bf16.mxu0 %v1763_v7  ;;  %727 = vmatprep.subr.bf16.mxu1 %v1774_v9 }
 0x127   : > { %716 = vmatprep.mubr.bf16.mxu0 %v1670_v4  ;;  %757 = vmatprep.mubr.bf16.mxu1 %v1670_v4 }
 0x129   : > { %687 = vmatpush1.bf16.msra.mxu0 %v1768_v8  ;;  %728 = vmatpush1.bf16.msra.mxu1 %v1781_v10 }
 0x12a   : > { %688 = vmatprep.subr.bf16.mxu0 %v1787_v11  ;;  %729 = vmatprep.subr.bf16.mxu1 %v1798_v13 }
 0x12d   : > { %689 = vmatpush1.bf16.msra.mxu0 %v1793_v12  ;;  %730 = vmatpush1.bf16.msra.mxu1 %v1810_v15 }
 0x12e   : > { %690 = vmatprep.subr.bf16.mxu0 %v1804_v14  ;;  %731 = vmatprep.subr.bf16.mxu1 %v1816_v16 }
 0x131   : > { %691 = vmatpush1.bf16.msra.mxu0 %v1822_v17  ;;  %732 = vmatpush1.bf16.msra.mxu1 %v1834_v19 }
 0x132   : > { %692 = vmatprep.subr.bf16.mxu0 %v1828_v18  ;;  %733 = vmatprep.subr.bf16.mxu1 %v1840_v20 }
 0x135   : > { %693 = vmatpush1.bf16.msra.mxu0 %v1846_v21  ;;  %734 = vmatpush1.bf16.msra.mxu1 %v1858_v23 }
 0x136   : > { %694 = vmatprep.subr.bf16.mxu0 %v1852_v22  ;;  %735 = vmatprep.subr.bf16.mxu1 %v1864_v24 }
 0x139   : > { %695 = vmatpush1.bf16.msra.mxu0 %v1870_v25  ;;  %736 = vmatpush1.bf16.msra.mxu1 %v1882_v27 }
 0x13a   : > { %696 = vmatprep.subr.bf16.mxu0 %v1876_v26  ;;  %737 = vmatprep.subr.bf16.mxu1 %v1888_v28 }
 0x13d   : > { %697 = vmatpush1.bf16.msra.mxu0 %v1894_v29  ;;  %738 = vmatpush1.bf16.msra.mxu1 %v1906_v31 }
 0x13e   : > { %698 = vmatprep.subr.bf16.mxu0 %v1900_v30  ;;  %739 = vmatprep.subr.bf16.mxu1 %v1912_v32 }
 0x141   : > { %699 = vmatpush1.bf16.msra.mxu0 %v1918_v33  ;;  %740 = vmatpush1.bf16.msra.mxu1 %v1928_v35 }
 0x142   : > { %796 = vmatprep.subr.bf16.mxu0 %v1739_v2  ;;  %837 = vmatprep.subr.bf16.mxu1 %v1752_v5 }
 0x1e4   : > { %v606_v43 = vpop.f32.mrf.mxu0  ;;  %v647_v44 = vpop.f32.mrf.mxu1 }
 0x1e5   : > { %v654_v46 = vadd.f32 %v1463_v42, %v606_v43  ;;  %v656_v57 = vadd.f32 %v1465_v51, %v647_v44 }
 0x1e6   : > { %v608_v47 = vpop.f32.mrf.mxu0  ;;  %v649_v48 = vpop.f32.mrf.mxu1 }
 0x1e7   : > { %v658_v49 = vmul.f32 0.5, %v654_v46  ;;  %v655_v50 = vadd.f32 %v1464_v45, %v608_v47  ;;  %v657_v59 = vadd.f32 %v1466_v58, %v649_v48 }
 0x1e8   : > { %v610_v52 = vpop.f32.mrf.mxu0  ;;  %v651_v53 = vpop.f32.mrf.mxu1 }
 0x1e9   : > { %1568 = vtanh.f32 %v658_v49  ;;  %v662_v54 = vmul.f32 0.5, %v655_v50  ;;  %v667_v60 = vmul.f32 0.5, %v657_v59  ;;  %v1469_v49 = vld [vmem:[%s1717_s28 + $0x48] sm:$0xff] }
 0x1ea   : > { %v611_v55 = vpop.f32.mrf.mxu0  ;;  %v652_v56 = vpop.f32.mrf.mxu1 }
 0x1eb   : > { %1570 = vtanh.f32 %v662_v54  ;;  %v1470_v55 = vld [vmem:[%s1717_s28 + $0x50] sm:$0xff] }
 0x1ec   : > { %1572 = vtanh.f32 %v656_v57 }
 0x1ed   : > { %1574 = vtanh.f32 %v667_v60 }
 0x1f6   : > { %v1569_v61 = vpop.eup %1568 }
 0x1f7   : > { %v660_v62 = vmul.f32 0.5, %v1569_v61 }
 0x1f8   : > { %v1571_v63 = vpop.eup %1570 }
 0x1f9   : > { %v661_v0 = vadd.f32 0.5, %v660_v62  ;;  %v664_v1 = vmul.f32 0.5, %v1571_v63  ;;  %v1573_v37 = vpop.eup %1572  ;;  %v1471_v62 = vld [vmem:[%s1717_s28 + $0x58] sm:$0xff] }
 0x1fa   : > { %v1575_v41 = vpop.eup %1574 }
 0x1fb   : > { %v665_v36 = vadd.f32 0.5, %v664_v1  ;;  %v672_v39 = vmul.f32 %v1573_v37, %v661_v0  ;;  %v669_v42 = vmul.f32 0.5, %v1575_v41 }
 0x1fd   : > { %v671_v38 = vmul.f32 %v665_v36, %v1976_v34  ;;  %v670_v43 = vadd.f32 0.5, %v669_v42  ;;  %v1468_v34 = vld [vmem:[%s1717_s28 + $0x40] sm:$0xff] }
 0x1ff   : > { %v2019_v40 = vadd.f32 %v672_v39, %v671_v38 }
 0x201   : > { %1576 = vtanh.f32 %v2019_v40 }
 0x20e   : > { %v1577_v44 = vpop.eup %1576 }
 0x20f   : > { %v675_v45 = vmul.f32 %v1577_v44, %v670_v43 }
 0x211   : > { %1467 = vst [vmem:[%s1722_s7 + $0x8] sm:$0xff] %v675_v45  ;;  %v683_v46 = vpack.c.bf16 %v675_v45, %v675_v45 }
 0x213   : > { %717 = vmatmul.mubr.bf16.vlgmr.msra.gmra.mxu0 %v683_v46  ;;  %758 = vmatmul.mubr.bf16.vlgmr.msra.gmra.mxu1 %v683_v46 }
 0x214   : > { %797 = vmatpush1.bf16.msra.mxu0 %v1744_v3  ;;  %838 = vmatpush1.bf16.msra.mxu1 %v1757_v6 }
 0x215   : > { %798 = vmatprep.subr.bf16.mxu0 %v1763_v7  ;;  %839 = vmatprep.subr.bf16.mxu1 %v1774_v9 }
 0x216   : > { %828 = vmatprep.mubr.bf16.mxu0 %v1670_v4  ;;  %869 = vmatprep.mubr.bf16.mxu1 %v1670_v4 }
 0x218   : > { %799 = vmatpush1.bf16.msra.mxu0 %v1768_v8  ;;  %840 = vmatpush1.bf16.msra.mxu1 %v1781_v10 }
 0x219   : > { %800 = vmatprep.subr.bf16.mxu0 %v1787_v11  ;;  %841 = vmatprep.subr.bf16.mxu1 %v1798_v13 }
 0x21c   : > { %801 = vmatpush1.bf16.msra.mxu0 %v1793_v12  ;;  %842 = vmatpush1.bf16.msra.mxu1 %v1810_v15 }
 0x21d   : > { %802 = vmatprep.subr.bf16.mxu0 %v1804_v14  ;;  %843 = vmatprep.subr.bf16.mxu1 %v1816_v16 }
 0x220   : > { %803 = vmatpush1.bf16.msra.mxu0 %v1822_v17  ;;  %844 = vmatpush1.bf16.msra.mxu1 %v1834_v19 }
 0x221   : > { %804 = vmatprep.subr.bf16.mxu0 %v1828_v18  ;;  %845 = vmatprep.subr.bf16.mxu1 %v1840_v20 }
 0x224   : > { %805 = vmatpush1.bf16.msra.mxu0 %v1846_v21  ;;  %846 = vmatpush1.bf16.msra.mxu1 %v1858_v23 }
 0x225   : > { %806 = vmatprep.subr.bf16.mxu0 %v1852_v22  ;;  %847 = vmatprep.subr.bf16.mxu1 %v1864_v24 }
 0x228   : > { %807 = vmatpush1.bf16.msra.mxu0 %v1870_v25  ;;  %848 = vmatpush1.bf16.msra.mxu1 %v1882_v27 }
 0x229   : > { %808 = vmatprep.subr.bf16.mxu0 %v1876_v26  ;;  %849 = vmatprep.subr.bf16.mxu1 %v1888_v28 }
 0x22c   : > { %809 = vmatpush1.bf16.msra.mxu0 %v1894_v29  ;;  %850 = vmatpush1.bf16.msra.mxu1 %v1906_v31 }
 0x22d   : > { %810 = vmatprep.subr.bf16.mxu0 %v1900_v30  ;;  %851 = vmatprep.subr.bf16.mxu1 %v1912_v32 }
 0x230   : > { %811 = vmatpush1.bf16.msra.mxu0 %v1918_v33  ;;  %852 = vmatpush1.bf16.msra.mxu1 %v1928_v35 }
 0x231   : > { %908 = vmatprep.subr.bf16.mxu0 %v1739_v2  ;;  %949 = vmatprep.subr.bf16.mxu1 %v1752_v5 }
 0x2d3   : > { %v718_v47 = vpop.f32.mrf.mxu0  ;;  %v759_v48 = vpop.f32.mrf.mxu1 }
 0x2d4   : > { %v766_v50 = vadd.f32 %v1468_v34, %v718_v47  ;;  %v768_v61 = vadd.f32 %v1470_v55, %v759_v48 }
 0x2d5   : > { %v720_v51 = vpop.f32.mrf.mxu0  ;;  %v761_v52 = vpop.f32.mrf.mxu1 }
 0x2d6   : > { %v770_v53 = vmul.f32 0.5, %v766_v50  ;;  %v767_v54 = vadd.f32 %v1469_v49, %v720_v51  ;;  %v769_v63 = vadd.f32 %v1471_v62, %v761_v52 }
 0x2d7   : > { %v722_v56 = vpop.f32.mrf.mxu0  ;;  %v763_v57 = vpop.f32.mrf.mxu1 }
 0x2d8   : > { %1578 = vtanh.f32 %v770_v53  ;;  %v774_v58 = vmul.f32 0.5, %v767_v54  ;;  %v779_v0 = vmul.f32 0.5, %v769_v63  ;;  %v1474_v53 = vld [vmem:[%s1717_s28 + $0x68] sm:$0xff] }
 0x2d9   : > { %v723_v59 = vpop.f32.mrf.mxu0  ;;  %v764_v60 = vpop.f32.mrf.mxu1 }
 0x2da   : > { %1580 = vtanh.f32 %v774_v58  ;;  %v1475_v59 = vld [vmem:[%s1717_s28 + $0x70] sm:$0xff] }
 0x2db   : > { %1582 = vtanh.f32 %v768_v61 }
 0x2dc   : > { %1584 = vtanh.f32 %v779_v0 }
 0x2e5   : > { %v1579_v1 = vpop.eup %1578 }
 0x2e6   : > { %v772_v36 = vmul.f32 0.5, %v1579_v1 }
 0x2e7   : > { %v1581_v37 = vpop.eup %1580 }
 0x2e8   : > { %v773_v38 = vadd.f32 0.5, %v772_v36  ;;  %v776_v39 = vmul.f32 0.5, %v1581_v37  ;;  %v1583_v42 = vpop.eup %1582  ;;  %v1476_v36 = vld [vmem:[%s1717_s28 + $0x78] sm:$0xff] }
 0x2e9   : > { %v1585_v46 = vpop.eup %1584 }
 0x2ea   : > { %v777_v41 = vadd.f32 0.5, %v776_v39  ;;  %v784_v44 = vmul.f32 %v1583_v42, %v773_v38  ;;  %v781_v34 = vmul.f32 0.5, %v1585_v46 }
 0x2ec   : > { %v783_v43 = vmul.f32 %v777_v41, %v2019_v40  ;;  %v782_v47 = vadd.f32 0.5, %v781_v34  ;;  %v1473_v40 = vld [vmem:[%s1717_s28 + $0x60] sm:$0xff] }
 0x2ee   : > { %v2062_v45 = vadd.f32 %v784_v44, %v783_v43 }
 0x2f0   : > { %1586 = vtanh.f32 %v2062_v45 }
 0x2fd   : > { %v1587_v48 = vpop.eup %1586 }
 0x2fe   : > { %v787_v49 = vmul.f32 %v1587_v48, %v782_v47 }
 0x300   : > { %1472 = vst [vmem:[%s1722_s7 + $0x10] sm:$0xff] %v787_v49  ;;  %v795_v50 = vpack.c.bf16 %v787_v49, %v787_v49 }
 0x302   : > { %829 = vmatmul.mubr.bf16.vlgmr.msra.gmra.mxu0 %v795_v50  ;;  %870 = vmatmul.mubr.bf16.vlgmr.msra.gmra.mxu1 %v795_v50 }
 0x303   : > { %909 = vmatpush1.bf16.msra.mxu0 %v1744_v3  ;;  %950 = vmatpush1.bf16.msra.mxu1 %v1757_v6 }
 0x304   : > { %910 = vmatprep.subr.bf16.mxu0 %v1763_v7  ;;  %951 = vmatprep.subr.bf16.mxu1 %v1774_v9 }
 0x305   : > { %940 = vmatprep.mubr.bf16.mxu0 %v1670_v4  ;;  %981 = vmatprep.mubr.bf16.mxu1 %v1670_v4 }
 0x307   : > { %911 = vmatpush1.bf16.msra.mxu0 %v1768_v8  ;;  %952 = vmatpush1.bf16.msra.mxu1 %v1781_v10 }
 0x308   : > { %912 = vmatprep.subr.bf16.mxu0 %v1787_v11  ;;  %953 = vmatprep.subr.bf16.mxu1 %v1798_v13 }
 0x30b   : > { %913 = vmatpush1.bf16.msra.mxu0 %v1793_v12  ;;  %954 = vmatpush1.bf16.msra.mxu1 %v1810_v15 }
 0x30c   : > { %914 = vmatprep.subr.bf16.mxu0 %v1804_v14  ;;  %955 = vmatprep.subr.bf16.mxu1 %v1816_v16 }
 0x30f   : > { %915 = vmatpush1.bf16.msra.mxu0 %v1822_v17  ;;  %956 = vmatpush1.bf16.msra.mxu1 %v1834_v19 }
 0x310   : > { %916 = vmatprep.subr.bf16.mxu0 %v1828_v18  ;;  %957 = vmatprep.subr.bf16.mxu1 %v1840_v20 }
 0x313   : > { %917 = vmatpush1.bf16.msra.mxu0 %v1846_v21  ;;  %958 = vmatpush1.bf16.msra.mxu1 %v1858_v23 }
 0x314   : > { %918 = vmatprep.subr.bf16.mxu0 %v1852_v22  ;;  %959 = vmatprep.subr.bf16.mxu1 %v1864_v24 }
 0x317   : > { %919 = vmatpush1.bf16.msra.mxu0 %v1870_v25  ;;  %960 = vmatpush1.bf16.msra.mxu1 %v1882_v27 }
 0x318   : > { %920 = vmatprep.subr.bf16.mxu0 %v1876_v26  ;;  %961 = vmatprep.subr.bf16.mxu1 %v1888_v28 }
 0x31b   : > { %921 = vmatpush1.bf16.msra.mxu0 %v1894_v29  ;;  %962 = vmatpush1.bf16.msra.mxu1 %v1906_v31 }
 0x31c   : > { %922 = vmatprep.subr.bf16.mxu0 %v1900_v30  ;;  %963 = vmatprep.subr.bf16.mxu1 %v1912_v32 }
 0x31f   : > { %923 = vmatpush1.bf16.msra.mxu0 %v1918_v33  ;;  %964 = vmatpush1.bf16.msra.mxu1 %v1928_v35 }
 0x320   : > { %1020 = vmatprep.subr.bf16.mxu0 %v1739_v2  ;;  %1061 = vmatprep.subr.bf16.mxu1 %v1752_v5 }
 0x3c2   : > { %v830_v51 = vpop.f32.mrf.mxu0  ;;  %v871_v52 = vpop.f32.mrf.mxu1 }
 0x3c3   : > { %v878_v54 = vadd.f32 %v1473_v40, %v830_v51  ;;  %v880_v1 = vadd.f32 %v1475_v59, %v871_v52 }
 0x3c4   : > { %v832_v55 = vpop.f32.mrf.mxu0  ;;  %v873_v56 = vpop.f32.mrf.mxu1 }
 0x3c5   : > { %v882_v57 = vmul.f32 0.5, %v878_v54  ;;  %v879_v58 = vadd.f32 %v1474_v53, %v832_v55  ;;  %v881_v37 = vadd.f32 %v1476_v36, %v873_v56 }
 0x3c6   : > { %v834_v60 = vpop.f32.mrf.mxu0  ;;  %v875_v61 = vpop.f32.mrf.mxu1 }
 0x3c7   : > { %1588 = vtanh.f32 %v882_v57  ;;  %v886_v62 = vmul.f32 0.5, %v879_v58  ;;  %v891_v38 = vmul.f32 0.5, %v881_v37  ;;  %v1479_v57 = vld [vmem:[%s1717_s28 + $0x88] sm:$0xff] }
 0x3c8   : > { %v835_v63 = vpop.f32.mrf.mxu0  ;;  %v876_v0 = vpop.f32.mrf.mxu1 }
 0x3c9   : > { %1590 = vtanh.f32 %v886_v62  ;;  %v1480_v63 = vld [vmem:[%s1717_s28 + $0x90] sm:$0xff] }
 0x3ca   : > { %1592 = vtanh.f32 %v880_v1 }
 0x3cb   : > { %1594 = vtanh.f32 %v891_v38 }
 0x3d4   : > { %v1589_v39 = vpop.eup %1588 }
 0x3d5   : > { %v884_v41 = vmul.f32 0.5, %v1589_v39 }
 0x3d6   : > { %v1591_v42 = vpop.eup %1590 }
 0x3d7   : > { %v885_v43 = vadd.f32 0.5, %v884_v41  ;;  %v888_v44 = vmul.f32 0.5, %v1591_v42  ;;  %v1593_v34 = vpop.eup %1592 }
 0x3d8   : > { %v1595_v50 = vpop.eup %1594 }
 0x3d9   : > { %v889_v46 = vadd.f32 0.5, %v888_v44  ;;  %v896_v48 = vmul.f32 %v1593_v34, %v885_v43  ;;  %v893_v40 = vmul.f32 0.5, %v1595_v50 }
 0x3db   : > { %v895_v47 = vmul.f32 %v889_v46, %v2062_v45  ;;  %v894_v51 = vadd.f32 0.5, %v893_v40  ;;  %v1478_v45 = vld [vmem:[%s1717_s28 + $0x80] sm:$0xff] }
 0x3dd   : > { %v2105_v49 = vadd.f32 %v896_v48, %v895_v47 }
 0x3df   : > { %1596 = vtanh.f32 %v2105_v49 }
 0x3ec   : > { %v1597_v52 = vpop.eup %1596 }
 0x3ed   : > { %v899_v53 = vmul.f32 %v1597_v52, %v894_v51 }
 0x3ef   : > { %1477 = vst [vmem:[%s1722_s7 + $0x18] sm:$0xff] %v899_v53  ;;  %v907_v54 = vpack.c.bf16 %v899_v53, %v899_v53 }
 0x3f1   : > { %941 = vmatmul.mubr.bf16.vlgmr.msra.gmra.mxu0 %v907_v54  ;;  %982 = vmatmul.mubr.bf16.vlgmr.msra.gmra.mxu1 %v907_v54 }
 0x3f2   : > { %1021 = vmatpush1.bf16.msra.mxu0 %v1744_v3  ;;  %1062 = vmatpush1.bf16.msra.mxu1 %v1757_v6 }
 0x3f3   : > { %1022 = vmatprep.subr.bf16.mxu0 %v1763_v7  ;;  %1063 = vmatprep.subr.bf16.mxu1 %v1774_v9 }
 0x3f4   : > { %1052 = vmatprep.mubr.bf16.mxu0 %v1670_v4  ;;  %1093 = vmatprep.mubr.bf16.mxu1 %v1670_v4 }
 0x3f6   : > { %1023 = vmatpush1.bf16.msra.mxu0 %v1768_v8  ;;  %1064 = vmatpush1.bf16.msra.mxu1 %v1781_v10 }
 0x3f7   : > { %1024 = vmatprep.subr.bf16.mxu0 %v1787_v11  ;;  %1065 = vmatprep.subr.bf16.mxu1 %v1798_v13 }
 0x3fa   : > { %1025 = vmatpush1.bf16.msra.mxu0 %v1793_v12  ;;  %1066 = vmatpush1.bf16.msra.mxu1 %v1810_v15 }
 0x3fb   : > { %1026 = vmatprep.subr.bf16.mxu0 %v1804_v14  ;;  %1067 = vmatprep.subr.bf16.mxu1 %v1816_v16 }
 0x3fe   : > { %1027 = vmatpush1.bf16.msra.mxu0 %v1822_v17  ;;  %1068 = vmatpush1.bf16.msra.mxu1 %v1834_v19 }
 0x3ff   : > { %1028 = vmatprep.subr.bf16.mxu0 %v1828_v18  ;;  %1069 = vmatprep.subr.bf16.mxu1 %v1840_v20 }
 0x402   : > { %1029 = vmatpush1.bf16.msra.mxu0 %v1846_v21  ;;  %1070 = vmatpush1.bf16.msra.mxu1 %v1858_v23 }
 0x403   : > { %1030 = vmatprep.subr.bf16.mxu0 %v1852_v22  ;;  %1071 = vmatprep.subr.bf16.mxu1 %v1864_v24 }
 0x406   : > { %1031 = vmatpush1.bf16.msra.mxu0 %v1870_v25  ;;  %1072 = vmatpush1.bf16.msra.mxu1 %v1882_v27 }
 0x407   : > { %1032 = vmatprep.subr.bf16.mxu0 %v1876_v26  ;;  %1073 = vmatprep.subr.bf16.mxu1 %v1888_v28 }
 0x40a   : > { %1033 = vmatpush1.bf16.msra.mxu0 %v1894_v29  ;;  %1074 = vmatpush1.bf16.msra.mxu1 %v1906_v31 }
 0x40b   : > { %1034 = vmatprep.subr.bf16.mxu0 %v1900_v30  ;;  %1075 = vmatprep.subr.bf16.mxu1 %v1912_v32 }
 0x40e   : > { %1035 = vmatpush1.bf16.msra.mxu0 %v1918_v33  ;;  %1076 = vmatpush1.bf16.msra.mxu1 %v1928_v35 }
 0x40f   : > { %1132 = vmatprep.subr.bf16.mxu0 %v1739_v2  ;;  %1173 = vmatprep.subr.bf16.mxu1 %v1752_v5  ;;  %v1481_v5 = vld [vmem:[%s1717_s28 + $0x98] sm:$0xff] }
 0x4b1   : > { %v942_v55 = vpop.f32.mrf.mxu0  ;;  %v983_v56 = vpop.f32.mrf.mxu1 }
 0x4b2   : > { %v990_v58 = vadd.f32 %v1478_v45, %v942_v55  ;;  %v992_v2 = vadd.f32 %v1480_v63, %v983_v56 }
 0x4b3   : > { %v944_v59 = vpop.f32.mrf.mxu0  ;;  %v985_v60 = vpop.f32.mrf.mxu1 }
 0x4b4   : > { %v994_v61 = vmul.f32 0.5, %v990_v58  ;;  %v991_v62 = vadd.f32 %v1479_v57, %v944_v59  ;;  %v993_v39 = vadd.f32 %v1481_v5, %v985_v60 }
 0x4b5   : > { %v946_v0 = vpop.f32.mrf.mxu0  ;;  %v987_v1 = vpop.f32.mrf.mxu1 }
 0x4b6   : > { %1598 = vtanh.f32 %v994_v61  ;;  %v998_v36 = vmul.f32 0.5, %v991_v62  ;;  %v1003_v41 = vmul.f32 0.5, %v993_v39  ;;  %v1640_v39 = vld [vmem:[%s2296_s1 + $0xe0] ss:$16 sps:$4 sm:$0xff]  }
 0x4b7   : > { %v947_v37 = vpop.f32.mrf.mxu0  ;;  %v988_v38 = vpop.f32.mrf.mxu1 }
 0x4b8   : > { %1600 = vtanh.f32 %v998_v36 }
 0x4b9   : > { %1602 = vtanh.f32 %v992_v2 }
 0x4ba   : > { %1604 = vtanh.f32 %v1003_v41  ;;  %v1641_v41 = vld [vmem:[%s2296_s1 + $0xe8] ss:$16 sps:$4 sm:$0xff]  }
 0x4c3   : > { %v1599_v42 = vpop.eup %1598 }
 0x4c4   : > { %v996_v43 = vmul.f32 0.5, %v1599_v42  ;;  %v1642_v42 = vld [vmem:[%s2296_s1 + $0xc4] ss:$16 sps:$4 sm:$0xff]  }
 0x4c5   : > { %v1601_v44 = vpop.eup %1600 }
 0x4c6   : > { %v997_v46 = vadd.f32 0.5, %v996_v43  ;;  %v1000_v34 = vmul.f32 0.5, %v1601_v44  ;;  %v1603_v48 = vpop.eup %1602  ;;  %v1643_v43 = vld [vmem:[%s2296_s1 + $0xcc] ss:$16 sps:$4 sm:$0xff]   ;;  %v1644_v44 = vld [vmem:[%s2296_s1 + $0xc0] ss:$16 sps:$4 sm:$0xff]  }
 0x4c7   : > { %v1605_v52 = vpop.eup %1604 }
 0x4c8   : > { %v1001_v47 = vadd.f32 0.5, %v1000_v34  ;;  %v1008_v40 = vmul.f32 %v1603_v48, %v997_v46  ;;  %v1005_v53 = vmul.f32 0.5, %v1605_v52  ;;  %v1645_v46 = vld [vmem:[%s2296_s1 + $0xc8] ss:$16 sps:$4 sm:$0xff]   ;;  %v1646_v34 = vld [vmem:[%s2296_s1 + $0xa4] ss:$16 sps:$4 sm:$0xff]  }
 0x4c9   : > { %v1649_v48 = vld [vmem:[%s2296_s1 + $0xa8] ss:$16 sps:$4 sm:$0xff]  }
 0x4ca   : > { %v1007_v50 = vmul.f32 %v1001_v47, %v2105_v49  ;;  %v1006_v54 = vadd.f32 0.5, %v1005_v53  ;;  %v1647_v47 = vld [vmem:[%s2296_s1 + $0xac] ss:$16 sps:$4 sm:$0xff]   ;;  %v1653_v52 = vld [vmem:[%s2296_s1 + $0x88] ss:$16 sps:$4 sm:$0xff]  }
 0x4cb   : > { %v1654_v53 = vld [vmem:[%s2296_s1 + $0x64] ss:$16 sps:$4 sm:$0xff]  }
 0x4cc   : > { %v2148_v51 = vadd.f32 %v1008_v40, %v1007_v50  ;;  %v1650_v50 = vld [vmem:[%s2296_s1 + $0x84] ss:$16 sps:$4 sm:$0xff]   ;;  %v1651_v40 = vld [vmem:[%s2296_s1 + $0x8c] ss:$16 sps:$4 sm:$0xff]  }
 0x4ce   : > { %1606 = vtanh.f32 %v2148_v51 }
 0x4db   : > { %v1607_v45 = vpop.eup %1606 }
 0x4dc   : > { %v1011_v55 = vmul.f32 %v1607_v45, %v1006_v54  ;;  %v1655_v54 = vld [vmem:[%s2296_s1 + $0x6c] ss:$16 sps:$4 sm:$0xff]   ;;  %v1656_v45 = vld [vmem:[%s2296_s1 + $0x60] ss:$16 sps:$4 sm:$0xff]  }
 0x4de   : > { %1482 = vst [vmem:[%s1722_s7 + $0x20] sm:$0xff] %v1011_v55  ;;  %v1019_v56 = vpack.c.bf16 %v1011_v55, %v1011_v55  ;;  %v1657_v55 = vld [vmem:[%s2296_s1 + $0x68] ss:$16 sps:$4 sm:$0xff]  }
 0x4e0   : > { %1053 = vmatmul.mubr.bf16.vlgmr.msra.gmra.mxu0 %v1019_v56  ;;  %1094 = vmatmul.mubr.bf16.vlgmr.msra.gmra.mxu1 %v1019_v56  ;;  %v1658_v56 = vld [vmem:[%s2296_s1 + $0x44] ss:$16 sps:$4 sm:$0xff]  }
 0x4e1   : > { %1133 = vmatpush1.bf16.msra.mxu0 %v1744_v3  ;;  %1174 = vmatpush1.bf16.msra.mxu1 %v1757_v6  ;;  %v1638_v3 = vld [vmem:[%s2296_s1 + $0xe4] ss:$16 sps:$4 sm:$0xff]   ;;  %v1639_v6 = vld [vmem:[%s2296_s1 + $0xec] ss:$16 sps:$4 sm:$0xff]  }
 0x4e2   : > { %1134 = vmatprep.subr.bf16.mxu0 %v1763_v7  ;;  %1175 = vmatprep.subr.bf16.mxu1 %v1774_v9  ;;  %v1483_v7 = vld [vmem:[%s1717_s28 + $0xa0] sm:$0xff] }
 0x4e3   : > { %1164 = vmatprep.mubr.bf16.mxu0 %v1670_v4  ;;  %1205 = vmatprep.mubr.bf16.mxu1 %v1670_v4 }
 0x4e5   : > { %1135 = vmatpush1.bf16.msra.mxu0 %v1768_v8  ;;  %1176 = vmatpush1.bf16.msra.mxu1 %v1781_v10  ;;  %v1484_v10 = vld [vmem:[%s1717_s28 + $0xa8] sm:$0xff] }
 0x4e6   : > { %1136 = vmatprep.subr.bf16.mxu0 %v1787_v11  ;;  %1177 = vmatprep.subr.bf16.mxu1 %v1798_v13 }
 0x4e9   : > { %1137 = vmatpush1.bf16.msra.mxu0 %v1793_v12  ;;  %1178 = vmatpush1.bf16.msra.mxu1 %v1810_v15 }
 0x4ea   : > { %1138 = vmatprep.subr.bf16.mxu0 %v1804_v14  ;;  %1179 = vmatprep.subr.bf16.mxu1 %v1816_v16  ;;  %v1485_v16 = vld [vmem:[%s1717_s28 + $0xb0] sm:$0xff] }
 0x4ed   : > { %1139 = vmatpush1.bf16.msra.mxu0 %v1822_v17  ;;  %1180 = vmatpush1.bf16.msra.mxu1 %v1834_v19 }
 0x4ee   : > { %1140 = vmatprep.subr.bf16.mxu0 %v1828_v18  ;;  %1181 = vmatprep.subr.bf16.mxu1 %v1840_v20 }
 0x4f1   : > { %1141 = vmatpush1.bf16.msra.mxu0 %v1846_v21  ;;  %1182 = vmatpush1.bf16.msra.mxu1 %v1858_v23  ;;  %v1486_v23 = vld [vmem:[%s1717_s28 + $0xb8] sm:$0xff] }
 0x4f2   : > { %1142 = vmatprep.subr.bf16.mxu0 %v1852_v22  ;;  %1183 = vmatprep.subr.bf16.mxu1 %v1864_v24 }
 0x4f5   : > { %1143 = vmatpush1.bf16.msra.mxu0 %v1870_v25  ;;  %1184 = vmatpush1.bf16.msra.mxu1 %v1882_v27 }
 0x4f6   : > { %1144 = vmatprep.subr.bf16.mxu0 %v1876_v26  ;;  %1185 = vmatprep.subr.bf16.mxu1 %v1888_v28 }
 0x4f9   : > { %1145 = vmatpush1.bf16.msra.mxu0 %v1894_v29  ;;  %1186 = vmatpush1.bf16.msra.mxu1 %v1906_v31 }
 0x4fa   : > { %1146 = vmatprep.subr.bf16.mxu0 %v1900_v30  ;;  %1187 = vmatprep.subr.bf16.mxu1 %v1912_v32 }
 0x4fd   : > { %1147 = vmatpush1.bf16.msra.mxu0 %v1918_v33  ;;  %1188 = vmatpush1.bf16.msra.mxu1 %v1928_v35 }
 0x4fe   : > { %1244 = vmatprep.subr.bf16.mxu0 %v1638_v3  ;;  %1285 = vmatprep.subr.bf16.mxu1 %v1639_v6  ;;  %v1659_v3 = vld [vmem:[%s2296_s1 + $0x4c] ss:$16 sps:$4 sm:$0xff]   ;;  %v1660_v6 = vld [vmem:[%s2296_s1 + $0x40] ss:$16 sps:$4 sm:$0xff]  }
 0x5a0   : > { %v1054_v8 = vpop.f32.mrf.mxu0  ;;  %v1095_v9 = vpop.f32.mrf.mxu1 }
 0x5a1   : > { %v1102_v11 = vadd.f32 %v1483_v7, %v1054_v8  ;;  %v1104_v22 = vadd.f32 %v1485_v16, %v1095_v9  ;;  %v1661_v7 = vld [vmem:[%s2296_s1 + $0x24] ss:$16 sps:$4 sm:$0xff]  }
 0x5a2   : > { %v1056_v12 = vpop.f32.mrf.mxu0  ;;  %v1097_v13 = vpop.f32.mrf.mxu1 }
 0x5a3   : > { %v1106_v14 = vmul.f32 0.5, %v1102_v11  ;;  %v1103_v15 = vadd.f32 %v1484_v10, %v1056_v12  ;;  %v1105_v24 = vadd.f32 %v1486_v23, %v1097_v13  ;;  %v1489_v10 = vld [vmem:[%s1717_s28 + $0xc8] sm:$0xff] }
 0x5a4   : > { %v1058_v17 = vpop.f32.mrf.mxu0  ;;  %v1099_v18 = vpop.f32.mrf.mxu1 }
 0x5a5   : > { %1608 = vtanh.f32 %v1106_v14  ;;  %v1110_v19 = vmul.f32 0.5, %v1103_v15  ;;  %v1115_v25 = vmul.f32 0.5, %v1105_v24  ;;  %v1490_v14 = vld [vmem:[%s1717_s28 + $0xd0] sm:$0xff] }
 0x5a6   : > { %v1059_v20 = vpop.f32.mrf.mxu0  ;;  %v1100_v21 = vpop.f32.mrf.mxu1 }
 0x5a7   : > { %1610 = vtanh.f32 %v1110_v19 }
 0x5a8   : > { %1612 = vtanh.f32 %v1104_v22 }
 0x5a9   : > { %1614 = vtanh.f32 %v1115_v25 }
 0x5b2   : > { %v1609_v26 = vpop.eup %1608 }
 0x5b3   : > { %v1108_v49 = vmul.f32 0.5, %v1609_v26 }
 0x5b4   : > { %v1611_v57 = vpop.eup %1610 }
 0x5b5   : > { %v1109_v58 = vadd.f32 0.5, %v1108_v49  ;;  %v1112_v59 = vmul.f32 0.5, %v1611_v57  ;;  %v1613_v61 = vpop.eup %1612 }
 0x5b6   : > { %v1615_v1 = vpop.eup %1614 }
 0x5b7   : > { %v1113_v60 = vadd.f32 0.5, %v1112_v59  ;;  %v1120_v63 = vmul.f32 %v1613_v61, %v1109_v58  ;;  %v1117_v36 = vmul.f32 0.5, %v1615_v1  ;;  %v1493_v1 = vld [vmem:[%s1717_s28 + $0xe0] sm:$0xff] }
 0x5b9   : > { %v1119_v62 = vmul.f32 %v1113_v60, %v2148_v51  ;;  %v1118_v37 = vadd.f32 0.5, %v1117_v36  ;;  %v1652_v51 = vld [vmem:[%s2296_s1 + $0x80] ss:$16 sps:$4 sm:$0xff]  }
 0x5bb   : > { %v2195_v0 = vadd.f32 %v1120_v63, %v1119_v62 }
 0x5bd   : > { %1616 = vtanh.f32 %v2195_v0 }
 0x5ca   : > { %v1617_v38 = vpop.eup %1616 }
 0x5cb   : > { %v1123_v2 = vmul.f32 %v1617_v38, %v1118_v37  ;;  %v1494_v38 = vld [vmem:[%s1717_s28 + $0xe8] sm:$0xff] }
 0x5cd   : > { %1487 = vst [vmem:[%s1722_s7 + $0x28] sm:$0xff] %v1123_v2  ;;  %v1131_v5 = vpack.c.bf16 %v1123_v2, %v1123_v2 }
 0x5cf   : > { %1165 = vmatmul.mubr.bf16.vlgmr.msra.gmra.mxu0 %v1131_v5  ;;  %1206 = vmatmul.mubr.bf16.vlgmr.msra.gmra.mxu1 %v1131_v5 }
 0x5d0   : > { %1245 = vmatpush1.bf16.msra.mxu0 %v1640_v39  ;;  %1286 = vmatpush1.bf16.msra.mxu1 %v1641_v41 }
 0x5d1   : > { %1246 = vmatprep.subr.bf16.mxu0 %v1642_v42  ;;  %1287 = vmatprep.subr.bf16.mxu1 %v1643_v43  ;;  %v1495_v42 = vld [vmem:[%s1717_s28 + $0xf0] sm:$0xff] }
 0x5d2   : > { %1276 = vmatprep.mubr.bf16.mxu0 %v1670_v4  ;;  %1317 = vmatprep.mubr.bf16.mxu1 %v1670_v4  ;;  %v1648_v4 = vld [vmem:[%s2296_s1 + $0xa0] ss:$16 sps:$4 sm:$0xff]  }
 0x5d4   : > { %1247 = vmatpush1.bf16.msra.mxu0 %v1644_v44  ;;  %1288 = vmatpush1.bf16.msra.mxu1 %v1645_v46 }
 0x5d5   : > { %1248 = vmatprep.subr.bf16.mxu0 %v1646_v34  ;;  %1289 = vmatprep.subr.bf16.mxu1 %v1647_v47 }
 0x5d8   : > { %1249 = vmatpush1.bf16.msra.mxu0 %v1648_v4  ;;  %1290 = vmatpush1.bf16.msra.mxu1 %v1649_v48  ;;  %v1496_v48 = vld [vmem:[%s1717_s28 + $0xf8] sm:$0xff] }
 0x5d9   : > { %1250 = vmatprep.subr.bf16.mxu0 %v1650_v50  ;;  %1291 = vmatprep.subr.bf16.mxu1 %v1651_v40 }
 0x5dc   : > { %1251 = vmatpush1.bf16.msra.mxu0 %v1652_v51  ;;  %1292 = vmatpush1.bf16.msra.mxu1 %v1653_v52 }
 0x5dd   : > { %1252 = vmatprep.subr.bf16.mxu0 %v1654_v53  ;;  %1293 = vmatprep.subr.bf16.mxu1 %v1655_v54 }
 0x5e0   : > { %1253 = vmatpush1.bf16.msra.mxu0 %v1656_v45  ;;  %1294 = vmatpush1.bf16.msra.mxu1 %v1657_v55 }
 0x5e1   : > { %1254 = vmatprep.subr.bf16.mxu0 %v1658_v56  ;;  %1295 = vmatprep.subr.bf16.mxu1 %v1659_v3 }
 0x5e4   : > { %1255 = vmatpush1.bf16.msra.mxu0 %v1660_v6  ;;  %1296 = vmatpush1.bf16.msra.mxu1 %v1882_v27  ;;  %v1488_v27 = vld [vmem:[%s1717_s28 + $0xc0] sm:$0xff] }
 0x5e5   : > { %1256 = vmatprep.subr.bf16.mxu0 %v1661_v7  ;;  %1297 = vmatprep.subr.bf16.mxu1 %v1888_v28 }
 0x5e8   : > { %1257 = vmatpush1.bf16.msra.mxu0 %v1894_v29  ;;  %1298 = vmatpush1.bf16.msra.mxu1 %v1906_v31 }
 0x5e9   : > { %1258 = vmatprep.subr.bf16.mxu0 %v1900_v30  ;;  %1299 = vmatprep.subr.bf16.mxu1 %v1912_v32 }
 0x5ec   : > { %1259 = vmatpush1.bf16.msra.mxu0 %v1918_v33  ;;  %1300 = vmatpush1.bf16.msra.mxu1 %v1928_v35  ;;  %v1491_v35 = vld [vmem:[%s1717_s28 + $0xd8] sm:$0xff] }
 0x68f   : > { %v1166_v8 = vpop.f32.mrf.mxu0  ;;  %v1207_v9 = vpop.f32.mrf.mxu1 }
 0x690   : > { %v1214_v11 = vadd.f32 %v1488_v27, %v1166_v8  ;;  %v1216_v33 = vadd.f32 %v1490_v14, %v1207_v9 }
 0x691   : > { %v1168_v28 = vpop.f32.mrf.mxu0  ;;  %v1209_v12 = vpop.f32.mrf.mxu1 }
 0x692   : > { %v1218_v13 = vmul.f32 0.5, %v1214_v11  ;;  %v1215_v29 = vadd.f32 %v1489_v10, %v1168_v28  ;;  %v1217_v17 = vadd.f32 %v1491_v35, %v1209_v12 }
 0x693   : > { %v1170_v31 = vpop.f32.mrf.mxu0  ;;  %v1211_v15 = vpop.f32.mrf.mxu1 }
 0x694   : > { %1618 = vtanh.f32 %v1218_v13  ;;  %v1222_v30 = vmul.f32 0.5, %v1215_v29  ;;  %v1227_v18 = vmul.f32 0.5, %v1217_v17 }
 0x695   : > { %v1171_v32 = vpop.f32.mrf.mxu0  ;;  %v1212_v16 = vpop.f32.mrf.mxu1 }
 0x696   : > { %1620 = vtanh.f32 %v1222_v30 }
 0x697   : > { %1622 = vtanh.f32 %v1216_v33 }
 0x698   : > { %1624 = vtanh.f32 %v1227_v18 }
 0x6a1   : > { %v1619_v19 = vpop.eup %1618 }
 0x6a2   : > { %v1220_v20 = vmul.f32 0.5, %v1619_v19 }
 0x6a3   : > { %v1621_v21 = vpop.eup %1620 }
 0x6a4   : > { %v1221_v22 = vadd.f32 0.5, %v1220_v20  ;;  %v1224_v23 = vmul.f32 0.5, %v1621_v21  ;;  %v1623_v25 = vpop.eup %1622 }
 0x6a5   : > { %v1625_v58 = vpop.eup %1624 }
 0x6a6   : > { %v1225_v24 = vadd.f32 0.5, %v1224_v23  ;;  %v1232_v49 = vmul.f32 %v1623_v25, %v1221_v22  ;;  %v1229_v59 = vmul.f32 0.5, %v1625_v58 }
 0x6a8   : > { %v1231_v26 = vmul.f32 %v1225_v24, %v2195_v0  ;;  %v1230_v60 = vadd.f32 0.5, %v1229_v59 }
 0x6aa   : > { %v1233_v57 = vadd.f32 %v1232_v49, %v1231_v26 }
 0x6ac   : > { %1626 = vtanh.f32 %v1233_v57 }
 0x6b9   : > { %v1627_v61 = vpop.eup %1626 }
 0x6ba   : > { %v1235_v62 = vmul.f32 %v1627_v61, %v1230_v60 }
 0x6bc   : > { %1492 = vst [vmem:[%s1722_s7 + $0x30] sm:$0xff] %v1235_v62  ;;  %v1243_v63 = vpack.c.bf16 %v1235_v62, %v1235_v62 }
 0x6be   : > { %1277 = vmatmul.mubr.bf16.vlgmr.msra.gmra.mxu0 %v1243_v63  ;;  %1318 = vmatmul.mubr.bf16.vlgmr.msra.gmra.mxu1 %v1243_v63 }
 0x77e   : > { %v1278_v36 = vpop.f32.mrf.mxu0  ;;  %v1319_v37 = vpop.f32.mrf.mxu1 }
 0x77f   : > { %v1326_v0 = vadd.f32 %v1493_v1, %v1278_v36  ;;  %v1328_v4 = vadd.f32 %v1495_v42, %v1319_v37 }
 0x780   : > { %v1280_v2 = vpop.f32.mrf.mxu0  ;;  %v1321_v5 = vpop.f32.mrf.mxu1 }
 0x781   : > { %v1330_v39 = vmul.f32 0.5, %v1326_v0  ;;  %v1327_v41 = vadd.f32 %v1494_v38, %v1280_v2  ;;  %v1329_v50 = vadd.f32 %v1496_v48, %v1321_v5 }
 0x782   : > { %v1282_v43 = vpop.f32.mrf.mxu0  ;;  %v1323_v44 = vpop.f32.mrf.mxu1 }
 0x783   : > { %1628 = vtanh.f32 %v1330_v39  ;;  %v1334_v46 = vmul.f32 0.5, %v1327_v41  ;;  %v1339_v40 = vmul.f32 0.5, %v1329_v50 }
 0x784   : > { %v1283_v34 = vpop.f32.mrf.mxu0  ;;  %v1324_v47 = vpop.f32.mrf.mxu1 }
 0x785   : > { %1630 = vtanh.f32 %v1334_v46 }
 0x786   : > { %1632 = vtanh.f32 %v1328_v4 }
 0x787   : > { %1634 = vtanh.f32 %v1339_v40 }
 0x790   : > { %v1629_v51 = vpop.eup %1628 }
 0x791   : > { %v1332_v52 = vmul.f32 0.5, %v1629_v51 }
 0x792   : > { %v1631_v53 = vpop.eup %1630 }
 0x793   : > { %v1333_v54 = vadd.f32 0.5, %v1332_v52  ;;  %v1336_v45 = vmul.f32 0.5, %v1631_v53  ;;  %v1633_v56 = vpop.eup %1632 }
 0x794   : > { %v1635_v27 = vpop.eup %1634 }
 0x795   : > { %v1337_v55 = vadd.f32 0.5, %v1336_v45  ;;  %v1344_v6 = vmul.f32 %v1633_v56, %v1333_v54  ;;  %v1341_v8 = vmul.f32 0.5, %v1635_v27 }
 0x797   : > { %v1343_v3 = vmul.f32 %v1337_v55, %v1233_v57  ;;  %v1342_v9 = vadd.f32 0.5, %v1341_v8 }
 0x799   : > { %v1345_v7 = vadd.f32 %v1344_v6, %v1343_v3 }
 0x79b   : > { %1636 = vtanh.f32 %v1345_v7  ;;  %1351 = vst [vmem:[%s2301_s6] sm:$0xff] %v1345_v7 }
 0x7a8   : > { %v1637_v10 = vpop.eup %1636 }
 0x7a9   : > { %v1347_v11 = vmul.f32 %v1637_v10, %v1342_v9 }
 0x7ab   : > { %1497 = vst [vmem:[%s1722_s7 + $0x38] sm:$0xff] %v1347_v11  ;;  %1350 = vst [vmem:[%s2300_s5] sm:$0xff] %v1347_v11 }
 0x7ac PF: > { %s17_s21 = sadd.s32 1, %s1668_s21  }
 0x7ad   : > { %p14_p5 = scmp.ge.s32.totalorder %s17_s21, 4  }
 0x7af   :  { %16 = sbr.rel (!%p14_p5) target bundleno = 1 (0x1), region = 100 }

</bundles_post_ra>
